<compile_context>
chip_gen: v7x
topology: tpu7x:2x2x1
jax: 0.10.0
libtpu: 0.0.40
codegen_flags: <defaults>
</compile_context>

<pallas_src>
import math

import jax
import jax.numpy as jnp
from jax import lax
from jax.experimental import pallas as pl
from jax.experimental.pallas import tpu as pltpu


# ---------------------------------------------------------------------------
# Fused Pallas kernel: L LSTM layers + FC head, whole sequence in one call.
# ---------------------------------------------------------------------------
def _make_fused_lstm_kernel(L, T, B, H):
    """refs = [x_flat, h0, c0, (Wx, Wh, b) * L, fc_w, fc_b,
               out, hn, cn, g_scr, (seq_scr if L > 1)]"""
    unroll = min(T, 8)  # full unroll for short T, partial for long T

    def kernel(*refs):
        x_ref, h0_ref, c0_ref = refs[0], refs[1], refs[2]
        idx = 3
        layer_w = []
        for _ in range(L):
            layer_w.append((refs[idx], refs[idx + 1], refs[idx + 2]))
            idx += 3
        fcw_ref, fcb_ref = refs[idx], refs[idx + 1]
        idx += 2
        out_ref, hn_ref, cn_ref = refs[idx], refs[idx + 1], refs[idx + 2]
        idx += 3
        g_scr = refs[idx]                       # (T*B, 4H) gate pre-activations
        idx += 1
        seq_scr = refs[idx] if L > 1 else None  # (T*B, H) inter-layer acts

        h_last = None
        for l in range(L):
            wx_ref, wh_ref, b_ref = layer_w[l]

            # Hoisted input projection + bias: ONE big MXU matmul per layer.
            # The previous layer's full hidden sequence (or the input) is
            # consumed here, so seq_scr may be safely overwritten below.
            src_ref = x_ref if l == 0 else seq_scr
            g_scr[...] = (
                jnp.dot(src_ref[...], wx_ref[...],
                        preferred_element_type=jnp.float32)
                + b_ref[...])

            wh = wh_ref[...]                    # (H, 4H) hoisted weight load
            write_seq = l < L - 1               # last layer's sequence unused

            def step(t, carry, wh=wh, write_seq=write_seq):
                h, c = carry
                row = pl.multiple_of(t * B, B)  # sublane-aligned (B % 8 == 0)
                g = (g_scr[pl.ds(row, B), :]
                     + jnp.dot(h, wh, preferred_element_type=jnp.float32))
                # One sigmoid EUP pass over the whole lane-dense (B,4H) tile;
                # tanh only on the cell-candidate slice.
                s = jax.nn.sigmoid(g)
                i_g = s[:, 0 * H:1 * H]
                f_g = s[:, 1 * H:2 * H]
                o_g = s[:, 3 * H:4 * H]
                g_g = jnp.tanh(g[:, 2 * H:3 * H])
                c_new = f_g * c + i_g * g_g
                h_new = o_g * jnp.tanh(c_new)
                if write_seq:
                    seq_scr[pl.ds(row, B), :] = h_new
                return h_new, c_new

            h_fin, c_fin = lax.fori_loop(
                0, T, step, (h0_ref[l], c0_ref[l]), unroll=unroll)
            hn_ref[l] = h_fin
            cn_ref[l] = c_fin
            h_last = h_fin

        # Final Linear on the last layer's last hidden state (== out[:, -1, :]).
        # Output is padded to a 128-lane multiple -> unmasked lane-dense store.
        out_ref[...] = (jnp.dot(h_last, fcw_ref[...],
                                preferred_element_type=jnp.float32)
                        + fcb_ref[...])

    return kernel


def lstm_forward_pallas(x_flat, h0, c0, layer_params, fc_w_t, fc_b,
                        hidden_dim, T, B):
    """x_flat: (T*B, D) time-major, B already padded to a multiple of 8."""
    L = len(layer_params)
    H = hidden_dim
    O_pad = fc_w_t.shape[1]

    flat_w = []
    for (wx, wh, b) in layer_params:
        flat_w += [wx, wh, b]

    n_in = 3 + 3 * L + 2
    vmem_spec = pl.BlockSpec(memory_space=pltpu.MemorySpace.VMEM)

    scratch_shapes = [pltpu.VMEM((T * B, 4 * H), jnp.float32)]
    if L > 1:
        scratch_shapes.append(pltpu.VMEM((T * B, H), jnp.float32))

    # Size the scoped-VMEM limit from the actual buffers (with headroom),
    # capped at the smallest physical VMEM across generations (v7x: 64 MiB/TC).
    in_bytes = sum(a.size * a.dtype.itemsize
                   for a in (x_flat, h0, c0, *flat_w, fc_w_t, fc_b))
    out_bytes = (B * O_pad + 2 * L * B * H) * 4
    scr_bytes = (T * B * 4 * H + (T * B * H if L > 1 else 0)) * 4
    vmem_limit = int(min(64 * 1024 * 1024,
                         max(2 * (in_bytes + out_bytes) + scr_bytes + (1 << 20),
                             16 * 1024 * 1024)))

    out, hn, cn = pl.pallas_call(
        _make_fused_lstm_kernel(L, T, B, H),
        in_specs=[vmem_spec] * n_in,
        out_specs=[vmem_spec] * 3,
        out_shape=[
            jax.ShapeDtypeStruct((B, O_pad), jnp.float32),
            jax.ShapeDtypeStruct((L, B, H), jnp.float32),
            jax.ShapeDtypeStruct((L, B, H), jnp.float32),
        ],
        scratch_shapes=scratch_shapes,
        compiler_params=pltpu.CompilerParams(vmem_limit_bytes=vmem_limit),
    )(x_flat, h0, c0, *flat_w, fc_w_t, fc_b)
    return out, hn, cn


# ---------------------------------------------------------------------------
# Model wrapper (mirrors the PyTorch LSTMModel forward pass)
# ---------------------------------------------------------------------------
class LSTMModelPallas:

    def __init__(self, input_dim, hidden_dim, layer_dim, output_dim, key):
        self.input_dim = input_dim
        self.hidden_dim = hidden_dim
        self.layer_dim = layer_dim
        self.output_dim = output_dim

        k_lstm = 1.0 / math.sqrt(hidden_dim)
        self.raw_layers = []      # PyTorch-layout params (for the reference)
        self.layer_params = []    # pre-transposed / concatenated (kernel inputs)
        for l in range(layer_dim):
            d_in = input_dim if l == 0 else hidden_dim
            key, k1, k2, k3, k4 = jax.random.split(key, 5)
            w_ih = jax.random.uniform(k1, (4 * hidden_dim, d_in),
                                      jnp.float32, -k_lstm, k_lstm)
            w_hh = jax.random.uniform(k2, (4 * hidden_dim, hidden_dim),
                                      jnp.float32, -k_lstm, k_lstm)
            b_ih = jax.random.uniform(k3, (4 * hidden_dim,),
                                      jnp.float32, -k_lstm, k_lstm)
            b_hh = jax.random.uniform(k4, (4 * hidden_dim,),
                                      jnp.float32, -k_lstm, k_lstm)
            self.raw_layers.append((w_ih, w_hh, b_ih, b_hh))
            # Hoisted weight prep: (D_in, 4H), (H, 4H), (1, 4H); gate order i,f,g,o.
            # TODO(synk): on v6e/v7x cast Wx/Wh to bf16 (keep f32 accumulation)
            #             to halve weight VMEM/HBM traffic.
            self.layer_params.append((
                jnp.asarray(w_ih.T),
                jnp.asarray(w_hh.T),
                (b_ih + b_hh).reshape(1, 4 * hidden_dim),
            ))

        k_fc = 1.0 / math.sqrt(hidden_dim)
        key, k1, k2 = jax.random.split(key, 3)
        self.fc_w = jax.random.uniform(k1, (output_dim, hidden_dim),
                                       jnp.float32, -k_fc, k_fc)
        self.fc_b = jax.random.uniform(k2, (output_dim,),
                                       jnp.float32, -k_fc, k_fc)
        # FC weights padded to a 128-lane-multiple output width (lane-dense store).
        self.out_pad = ((output_dim + 127) // 128) * 128
        self.fc_w_t_pad = (jnp.zeros((hidden_dim, self.out_pad), jnp.float32)
                           .at[:, :output_dim].set(self.fc_w.T))
        self.fc_b_pad = (jnp.zeros((1, self.out_pad), jnp.float32)
                         .at[0, :output_dim].set(self.fc_b))

    def __call__(self, x, h0=None, c0=None):
        B, T, D = x.shape
        H, L = self.hidden_dim, self.layer_dim
        B_pad = max(8, ((B + 7) // 8) * 8)      # f32 sublane tile
        pad = B_pad - B

        if h0 is None or c0 is None:
            h0_p = jnp.zeros((L, B_pad, H), jnp.float32)
            c0_p = jnp.zeros((L, B_pad, H), jnp.float32)
        else:
            h0_p = jnp.pad(h0, ((0, 0), (0, pad), (0, 0))) if pad else h0
            c0_p = jnp.pad(c0, ((0, 0), (0, pad), (0, 0))) if pad else c0

        x_p = jnp.pad(x, ((0, pad), (0, 0), (0, 0))) if pad else x
        # time-major, flattened to (T*B_pad, D): no in-kernel reshapes needed.
        x_flat = jnp.transpose(x_p, (1, 0, 2)).reshape(T * B_pad, D)

        out, hn, cn = lstm_forward_pallas(
            x_flat, h0_p, c0_p, self.layer_params,
            self.fc_w_t_pad, self.fc_b_pad, H, T, B_pad)
        return out[:B, :self.output_dim], hn[:, :B, :], cn[:, :B, :]


# ---------------------------------------------------------------------------
# Pure-JAX reference (correctness sanity check)
# ---------------------------------------------------------------------------
def _reference(model, x, h0, c0):
    B, T, _ = x.shape
    H, L = model.hidden_dim, model.layer_dim
    inp = x
    hns, cns = [], []
    for l in range(L):
        w_ih, w_hh, b_ih, b_hh = model.raw_layers[l]
        h = h0[l]
        c = c0[l]
        ys = []
        for t in range(T):
            g = inp[:, t, :] @ w_ih.T + h @ w_hh.T + b_ih + b_hh
            i = jax.nn.sigmoid(g[:, 0 * H:1 * H])
            f = jax.nn.sigmoid(g[:, 1 * H:2 * H])
            gg = jnp.tanh(g[:, 2 * H:3 * H])
            o = jax.nn.sigmoid(g[:, 3 * H:4 * H])
            c = f * c + i * gg
            h = o * jnp.tanh(c)
            ys.append(h)
        inp = jnp.stack(ys, axis=1)
        hns.append(h)
        cns.append(c)
    out = hns[-1] @ model.fc_w.T + model.fc_b
    return out, jnp.stack(hns), jnp.stack(cns)


if __name__ == "__main__":
    batch, seq, input_dim, hidden_dim, layer_dim, output_dim = 2, 8, 16, 32, 2, 4

    key = jax.random.PRNGKey(0)
    key, k_x, k_m = jax.random.split(key, 3)
    x = jax.random.normal(k_x, (batch, seq, input_dim), jnp.float32)

    model = LSTMModelPallas(input_dim, hidden_dim, layer_dim, output_dim, k_m)

    out, hn, cn = model(x)
    out = jax.block_until_ready(out)
    hn = jax.block_until_ready(hn)
    cn = jax.block_until_ready(cn)

    assert out.shape == (batch, output_dim)
    assert hn.shape == (layer_dim, batch, hidden_dim)
    assert cn.shape == (layer_dim, batch, hidden_dim)

    # correctness check against pure-JAX reference
    h0 = jnp.zeros((layer_dim, batch, hidden_dim), jnp.float32)
    c0 = jnp.zeros((layer_dim, batch, hidden_dim), jnp.float32)
    ref_out, ref_hn, ref_cn = _reference(model, x, h0, c0)
    assert jnp.allclose(out, ref_out, atol=1e-3, rtol=1e-3)
    assert jnp.allclose(hn, ref_hn, atol=1e-3, rtol=1e-3)
    assert jnp.allclose(cn, ref_cn, atol=1e-3, rtol=1e-3)

    print("KERNEL_OK")
</pallas_src>

<mosaic_0001>
module attributes {stable_mosaic.version = 11 : i64} {
  func.func @kernel(%arg0: memref<64x16xf32, #tpu.memory_space<vmem>>, %arg1: memref<2x8x32xf32, #tpu.memory_space<vmem>>, %arg2: memref<2x8x32xf32, #tpu.memory_space<vmem>>, %arg3: memref<16x128xf32, #tpu.memory_space<vmem>>, %arg4: memref<32x128xf32, #tpu.memory_space<vmem>>, %arg5: memref<1x128xf32, #tpu.memory_space<vmem>>, %arg6: memref<32x128xf32, #tpu.memory_space<vmem>>, %arg7: memref<32x128xf32, #tpu.memory_space<vmem>>, %arg8: memref<1x128xf32, #tpu.memory_space<vmem>>, %arg9: memref<32x128xf32, #tpu.memory_space<vmem>>, %arg10: memref<1x128xf32, #tpu.memory_space<vmem>>, %arg11: memref<8x128xf32, #tpu.memory_space<vmem>>, %arg12: memref<2x8x32xf32, #tpu.memory_space<vmem>>, %arg13: memref<2x8x32xf32, #tpu.memory_space<vmem>>, %arg14: memref<64x128xf32, #tpu.memory_space<vmem>>, %arg15: memref<64x32xf32, #tpu.memory_space<vmem>>) attributes {dimension_semantics = [], scalar_prefetch = 0 : i64, scratch_operands = 2 : i64, tpu.core_type = #tpu.core_type<tc>} {
    %c0 = arith.constant 0 : index
    %c0_0 = arith.constant 0 : index
    %0 = vector.load %arg0[%c0, %c0_0] : memref<64x16xf32, #tpu.memory_space<vmem>>, vector<64x16xf32>
    %c0_1 = arith.constant 0 : index
    %c0_2 = arith.constant 0 : index
    %1 = vector.load %arg3[%c0_1, %c0_2] : memref<16x128xf32, #tpu.memory_space<vmem>>, vector<16x128xf32>
    %cst = arith.constant dense<0.000000e+00> : vector<64x128xf32>
    %2 = tpu.matmul %0, %1, %cst {dimension_numbers = #tpu.dot_dimension_numbers<[1], [0], [0], [1], [0, 0, 1, 1], [], []>} : vector<64x16xf32>, vector<16x128xf32>, vector<64x128xf32> -> vector<64x128xf32>
    %c0_3 = arith.constant 0 : index
    %c0_4 = arith.constant 0 : index
    %3 = vector.load %arg5[%c0_3, %c0_4] : memref<1x128xf32, #tpu.memory_space<vmem>>, vector<1x128xf32>
    %4 = vector.broadcast %3 : vector<1x128xf32> to vector<64x128xf32>
    %5 = arith.addf %2, %4 : vector<64x128xf32>
    %c0_5 = arith.constant 0 : index
    %c0_6 = arith.constant 0 : index
    %6 = vector.load %arg14[%c0_5, %c0_6] : memref<64x128xf32, #tpu.memory_space<vmem>>, vector<64x128xf32>
    tpu.vector_store %arg14[%c0_5, %c0_6], %5 {strides = array<i32>} : memref<64x128xf32, #tpu.memory_space<vmem>>, vector<64x128xf32>,
    %c0_7 = arith.constant 0 : index
    %c0_8 = arith.constant 0 : index
    %7 = vector.load %arg4[%c0_7, %c0_8] : memref<32x128xf32, #tpu.memory_space<vmem>>, vector<32x128xf32>
    %c0_9 = arith.constant 0 : index
    %c0_10 = arith.constant 0 : index
    %c0_11 = arith.constant 0 : index
    %8 = vector.load %arg1[%c0_9, %c0_10, %c0_11] : memref<2x8x32xf32, #tpu.memory_space<vmem>>, vector<1x8x32xf32>
    %9 = vector.shape_cast %8 : vector<1x8x32xf32> to vector<8x32xf32>
    %c0_12 = arith.constant 0 : index
    %c0_13 = arith.constant 0 : index
    %c0_14 = arith.constant 0 : index
    %10 = vector.load %arg2[%c0_12, %c0_13, %c0_14] : memref<2x8x32xf32, #tpu.memory_space<vmem>>, vector<1x8x32xf32>
    %11 = vector.shape_cast %10 : vector<1x8x32xf32> to vector<8x32xf32>
    %c0_i32 = arith.constant 0 : i32
    %c8_i32 = arith.constant 8 : i32
    %12 = arith.muli %c0_i32, %c8_i32 : i32
    %13 = tpu.assume_multiple %12, 8 : i32
    %14 = arith.index_cast %13 : i32 to index
    %c0_15 = arith.constant 0 : index
    %15 = vector.load %arg14[%14, %c0_15] : memref<64x128xf32, #tpu.memory_space<vmem>>, vector<8x128xf32>
    %cst_16 = arith.constant dense<0.000000e+00> : vector<8x128xf32>
    %16 = tpu.matmul %9, %7, %cst_16 {dimension_numbers = #tpu.dot_dimension_numbers<[1], [0], [0], [1], [0, 0, 1, 1], [], []>} : vector<8x32xf32>, vector<32x128xf32>, vector<8x128xf32> -> vector<8x128xf32>
    %17 = arith.addf %15, %16 : vector<8x128xf32>
    %18 = arith.negf %17 : vector<8x128xf32>
    %19 = math.exp %18 : vector<8x128xf32>
    %cst_17 = arith.constant 1.000000e+00 : f32
    %20 = vector.broadcast %cst_17 : f32 to vector<8x128xf32>
    %21 = arith.addf %20, %19 : vector<8x128xf32>
    %22 = arith.divf %20, %21 : vector<8x128xf32>
    %23 = vector.extract_strided_slice %22 {offsets = [0, 0], sizes = [8, 32], strides = [1, 1]} : vector<8x128xf32> to vector<8x32xf32>
    %24 = vector.extract_strided_slice %22 {offsets = [0, 32], sizes = [8, 32], strides = [1, 1]} : vector<8x128xf32> to vector<8x32xf32>
    %25 = vector.extract_strided_slice %22 {offsets = [0, 96], sizes = [8, 32], strides = [1, 1]} : vector<8x128xf32> to vector<8x32xf32>
    %26 = vector.extract_strided_slice %17 {offsets = [0, 64], sizes = [8, 32], strides = [1, 1]} : vector<8x128xf32> to vector<8x32xf32>
    %27 = math.tanh %26 : vector<8x32xf32>
    %28 = arith.mulf %24, %11 : vector<8x32xf32>
    %29 = arith.mulf %23, %27 : vector<8x32xf32>
    %30 = arith.addf %28, %29 : vector<8x32xf32>
    %31 = math.tanh %30 : vector<8x32xf32>
    %32 = arith.mulf %25, %31 : vector<8x32xf32>
    %33 = arith.index_cast %13 : i32 to index
    %c0_18 = arith.constant 0 : index
    %34 = vector.load %arg15[%33, %c0_18] : memref<64x32xf32, #tpu.memory_space<vmem>>, vector<8x32xf32>
    tpu.vector_store %arg15[%33, %c0_18], %32 {strides = array<i32>} : memref<64x32xf32, #tpu.memory_space<vmem>>, vector<8x32xf32>,
    %c1_i32 = arith.constant 1 : i32
    %c8_i32_19 = arith.constant 8 : i32
    %35 = arith.muli %c1_i32, %c8_i32_19 : i32
    %36 = tpu.assume_multiple %35, 8 : i32
    %37 = arith.index_cast %36 : i32 to index
    %c0_20 = arith.constant 0 : index
    %38 = vector.load %arg14[%37, %c0_20] : memref<64x128xf32, #tpu.memory_space<vmem>>, vector<8x128xf32>
    %cst_21 = arith.constant dense<0.000000e+00> : vector<8x128xf32>
    %39 = tpu.matmul %32, %7, %cst_21 {dimension_numbers = #tpu.dot_dimension_numbers<[1], [0], [0], [1], [0, 0, 1, 1], [], []>} : vector<8x32xf32>, vector<32x128xf32>, vector<8x128xf32> -> vector<8x128xf32>
    %40 = arith.addf %38, %39 : vector<8x128xf32>
    %41 = arith.negf %40 : vector<8x128xf32>
    %42 = math.exp %41 : vector<8x128xf32>
    %cst_22 = arith.constant 1.000000e+00 : f32
    %43 = vector.broadcast %cst_22 : f32 to vector<8x128xf32>
    %44 = arith.addf %43, %42 : vector<8x128xf32>
    %45 = arith.divf %43, %44 : vector<8x128xf32>
    %46 = vector.extract_strided_slice %45 {offsets = [0, 0], sizes = [8, 32], strides = [1, 1]} : vector<8x128xf32> to vector<8x32xf32>
    %47 = vector.extract_strided_slice %45 {offsets = [0, 32], sizes = [8, 32], strides = [1, 1]} : vector<8x128xf32> to vector<8x32xf32>
    %48 = vector.extract_strided_slice %45 {offsets = [0, 96], sizes = [8, 32], strides = [1, 1]} : vector<8x128xf32> to vector<8x32xf32>
    %49 = vector.extract_strided_slice %40 {offsets = [0, 64], sizes = [8, 32], strides = [1, 1]} : vector<8x128xf32> to vector<8x32xf32>
    %50 = math.tanh %49 : vector<8x32xf32>
    %51 = arith.mulf %47, %30 : vector<8x32xf32>
    %52 = arith.mulf %46, %50 : vector<8x32xf32>
    %53 = arith.addf %51, %52 : vector<8x32xf32>
    %54 = math.tanh %53 : vector<8x32xf32>
    %55 = arith.mulf %48, %54 : vector<8x32xf32>
    %56 = arith.index_cast %36 : i32 to index
    %c0_23 = arith.constant 0 : index
    %57 = vector.load %arg15[%56, %c0_23] : memref<64x32xf32, #tpu.memory_space<vmem>>, vector<8x32xf32>
    tpu.vector_store %arg15[%56, %c0_23], %55 {strides = array<i32>} : memref<64x32xf32, #tpu.memory_space<vmem>>, vector<8x32xf32>,
    %c2_i32 = arith.constant 2 : i32
    %c8_i32_24 = arith.constant 8 : i32
    %58 = arith.muli %c2_i32, %c8_i32_24 : i32
    %59 = tpu.assume_multiple %58, 8 : i32
    %60 = arith.index_cast %59 : i32 to index
    %c0_25 = arith.constant 0 : index
    %61 = vector.load %arg14[%60, %c0_25] : memref<64x128xf32, #tpu.memory_space<vmem>>, vector<8x128xf32>
    %cst_26 = arith.constant dense<0.000000e+00> : vector<8x128xf32>
    %62 = tpu.matmul %55, %7, %cst_26 {dimension_numbers = #tpu.dot_dimension_numbers<[1], [0], [0], [1], [0, 0, 1, 1], [], []>} : vector<8x32xf32>, vector<32x128xf32>, vector<8x128xf32> -> vector<8x128xf32>
    %63 = arith.addf %61, %62 : vector<8x128xf32>
    %64 = arith.negf %63 : vector<8x128xf32>
    %65 = math.exp %64 : vector<8x128xf32>
    %cst_27 = arith.constant 1.000000e+00 : f32
    %66 = vector.broadcast %cst_27 : f32 to vector<8x128xf32>
    %67 = arith.addf %66, %65 : vector<8x128xf32>
    %68 = arith.divf %66, %67 : vector<8x128xf32>
    %69 = vector.extract_strided_slice %68 {offsets = [0, 0], sizes = [8, 32], strides = [1, 1]} : vector<8x128xf32> to vector<8x32xf32>
    %70 = vector.extract_strided_slice %68 {offsets = [0, 32], sizes = [8, 32], strides = [1, 1]} : vector<8x128xf32> to vector<8x32xf32>
    %71 = vector.extract_strided_slice %68 {offsets = [0, 96], sizes = [8, 32], strides = [1, 1]} : vector<8x128xf32> to vector<8x32xf32>
    %72 = vector.extract_strided_slice %63 {offsets = [0, 64], sizes = [8, 32], strides = [1, 1]} : vector<8x128xf32> to vector<8x32xf32>
    %73 = math.tanh %72 : vector<8x32xf32>
    %74 = arith.mulf %70, %53 : vector<8x32xf32>
    %75 = arith.mulf %69, %73 : vector<8x32xf32>
    %76 = arith.addf %74, %75 : vector<8x32xf32>
    %77 = math.tanh %76 : vector<8x32xf32>
    %78 = arith.mulf %71, %77 : vector<8x32xf32>
    %79 = arith.index_cast %59 : i32 to index
    %c0_28 = arith.constant 0 : index
    %80 = vector.load %arg15[%79, %c0_28] : memref<64x32xf32, #tpu.memory_space<vmem>>, vector<8x32xf32>
    tpu.vector_store %arg15[%79, %c0_28], %78 {strides = array<i32>} : memref<64x32xf32, #tpu.memory_space<vmem>>, vector<8x32xf32>,
    %c3_i32 = arith.constant 3 : i32
    %c8_i32_29 = arith.constant 8 : i32
    %81 = arith.muli %c3_i32, %c8_i32_29 : i32
    %82 = tpu.assume_multiple %81, 8 : i32
    %83 = arith.index_cast %82 : i32 to index
    %c0_30 = arith.constant 0 : index
    %84 = vector.load %arg14[%83, %c0_30] : memref<64x128xf32, #tpu.memory_space<vmem>>, vector<8x128xf32>
    %cst_31 = arith.constant dense<0.000000e+00> : vector<8x128xf32>
    %85 = tpu.matmul %78, %7, %cst_31 {dimension_numbers = #tpu.dot_dimension_numbers<[1], [0], [0], [1], [0, 0, 1, 1], [], []>} : vector<8x32xf32>, vector<32x128xf32>, vector<8x128xf32> -> vector<8x128xf32>
    %86 = arith.addf %84, %85 : vector<8x128xf32>
    %87 = arith.negf %86 : vector<8x128xf32>
    %88 = math.exp %87 : vector<8x128xf32>
    %cst_32 = arith.constant 1.000000e+00 : f32
    %89 = vector.broadcast %cst_32 : f32 to vector<8x128xf32>
    %90 = arith.addf %89, %88 : vector<8x128xf32>
    %91 = arith.divf %89, %90 : vector<8x128xf32>
    %92 = vector.extract_strided_slice %91 {offsets = [0, 0], sizes = [8, 32], strides = [1, 1]} : vector<8x128xf32> to vector<8x32xf32>
    %93 = vector.extract_strided_slice %91 {offsets = [0, 32], sizes = [8, 32], strides = [1, 1]} : vector<8x128xf32> to vector<8x32xf32>
    %94 = vector.extract_strided_slice %91 {offsets = [0, 96], sizes = [8, 32], strides = [1, 1]} : vector<8x128xf32> to vector<8x32xf32>
    %95 = vector.extract_strided_slice %86 {offsets = [0, 64], sizes = [8, 32], strides = [1, 1]} : vector<8x128xf32> to vector<8x32xf32>
    %96 = math.tanh %95 : vector<8x32xf32>
    %97 = arith.mulf %93, %76 : vector<8x32xf32>
    %98 = arith.mulf %92, %96 : vector<8x32xf32>
    %99 = arith.addf %97, %98 : vector<8x32xf32>
    %100 = math.tanh %99 : vector<8x32xf32>
    %101 = arith.mulf %94, %100 : vector<8x32xf32>
    %102 = arith.index_cast %82 : i32 to index
    %c0_33 = arith.constant 0 : index
    %103 = vector.load %arg15[%102, %c0_33] : memref<64x32xf32, #tpu.memory_space<vmem>>, vector<8x32xf32>
    tpu.vector_store %arg15[%102, %c0_33], %101 {strides = array<i32>} : memref<64x32xf32, #tpu.memory_space<vmem>>, vector<8x32xf32>,
    %c4_i32 = arith.constant 4 : i32
    %c8_i32_34 = arith.constant 8 : i32
    %104 = arith.muli %c4_i32, %c8_i32_34 : i32
    %105 = tpu.assume_multiple %104, 8 : i32
    %106 = arith.index_cast %105 : i32 to index
    %c0_35 = arith.constant 0 : index
    %107 = vector.load %arg14[%106, %c0_35] : memref<64x128xf32, #tpu.memory_space<vmem>>, vector<8x128xf32>
    %cst_36 = arith.constant dense<0.000000e+00> : vector<8x128xf32>
    %108 = tpu.matmul %101, %7, %cst_36 {dimension_numbers = #tpu.dot_dimension_numbers<[1], [0], [0], [1], [0, 0, 1, 1], [], []>} : vector<8x32xf32>, vector<32x128xf32>, vector<8x128xf32> -> vector<8x128xf32>
    %109 = arith.addf %107, %108 : vector<8x128xf32>
    %110 = arith.negf %109 : vector<8x128xf32>
    %111 = math.exp %110 : vector<8x128xf32>
    %cst_37 = arith.constant 1.000000e+00 : f32
    %112 = vector.broadcast %cst_37 : f32 to vector<8x128xf32>
    %113 = arith.addf %112, %111 : vector<8x128xf32>
    %114 = arith.divf %112, %113 : vector<8x128xf32>
    %115 = vector.extract_strided_slice %114 {offsets = [0, 0], sizes = [8, 32], strides = [1, 1]} : vector<8x128xf32> to vector<8x32xf32>
    %116 = vector.extract_strided_slice %114 {offsets = [0, 32], sizes = [8, 32], strides = [1, 1]} : vector<8x128xf32> to vector<8x32xf32>
    %117 = vector.extract_strided_slice %114 {offsets = [0, 96], sizes = [8, 32], strides = [1, 1]} : vector<8x128xf32> to vector<8x32xf32>
    %118 = vector.extract_strided_slice %109 {offsets = [0, 64], sizes = [8, 32], strides = [1, 1]} : vector<8x128xf32> to vector<8x32xf32>
    %119 = math.tanh %118 : vector<8x32xf32>
    %120 = arith.mulf %116, %99 : vector<8x32xf32>
    %121 = arith.mulf %115, %119 : vector<8x32xf32>
    %122 = arith.addf %120, %121 : vector<8x32xf32>
    %123 = math.tanh %122 : vector<8x32xf32>
    %124 = arith.mulf %117, %123 : vector<8x32xf32>
    %125 = arith.index_cast %105 : i32 to index
    %c0_38 = arith.constant 0 : index
    %126 = vector.load %arg15[%125, %c0_38] : memref<64x32xf32, #tpu.memory_space<vmem>>, vector<8x32xf32>
    tpu.vector_store %arg15[%125, %c0_38], %124 {strides = array<i32>} : memref<64x32xf32, #tpu.memory_space<vmem>>, vector<8x32xf32>,
    %c5_i32 = arith.constant 5 : i32
    %c8_i32_39 = arith.constant 8 : i32
    %127 = arith.muli %c5_i32, %c8_i32_39 : i32
    %128 = tpu.assume_multiple %127, 8 : i32
    %129 = arith.index_cast %128 : i32 to index
    %c0_40 = arith.constant 0 : index
    %130 = vector.load %arg14[%129, %c0_40] : memref<64x128xf32, #tpu.memory_space<vmem>>, vector<8x128xf32>
    %cst_41 = arith.constant dense<0.000000e+00> : vector<8x128xf32>
    %131 = tpu.matmul %124, %7, %cst_41 {dimension_numbers = #tpu.dot_dimension_numbers<[1], [0], [0], [1], [0, 0, 1, 1], [], []>} : vector<8x32xf32>, vector<32x128xf32>, vector<8x128xf32> -> vector<8x128xf32>
    %132 = arith.addf %130, %131 : vector<8x128xf32>
    %133 = arith.negf %132 : vector<8x128xf32>
    %134 = math.exp %133 : vector<8x128xf32>
    %cst_42 = arith.constant 1.000000e+00 : f32
    %135 = vector.broadcast %cst_42 : f32 to vector<8x128xf32>
    %136 = arith.addf %135, %134 : vector<8x128xf32>
    %137 = arith.divf %135, %136 : vector<8x128xf32>
    %138 = vector.extract_strided_slice %137 {offsets = [0, 0], sizes = [8, 32], strides = [1, 1]} : vector<8x128xf32> to vector<8x32xf32>
    %139 = vector.extract_strided_slice %137 {offsets = [0, 32], sizes = [8, 32], strides = [1, 1]} : vector<8x128xf32> to vector<8x32xf32>
    %140 = vector.extract_strided_slice %137 {offsets = [0, 96], sizes = [8, 32], strides = [1, 1]} : vector<8x128xf32> to vector<8x32xf32>
    %141 = vector.extract_strided_slice %132 {offsets = [0, 64], sizes = [8, 32], strides = [1, 1]} : vector<8x128xf32> to vector<8x32xf32>
    %142 = math.tanh %141 : vector<8x32xf32>
    %143 = arith.mulf %139, %122 : vector<8x32xf32>
    %144 = arith.mulf %138, %142 : vector<8x32xf32>
    %145 = arith.addf %143, %144 : vector<8x32xf32>
    %146 = math.tanh %145 : vector<8x32xf32>
    %147 = arith.mulf %140, %146 : vector<8x32xf32>
    %148 = arith.index_cast %128 : i32 to index
    %c0_43 = arith.constant 0 : index
    %149 = vector.load %arg15[%148, %c0_43] : memref<64x32xf32, #tpu.memory_space<vmem>>, vector<8x32xf32>
    tpu.vector_store %arg15[%148, %c0_43], %147 {strides = array<i32>} : memref<64x32xf32, #tpu.memory_space<vmem>>, vector<8x32xf32>,
    %c6_i32 = arith.constant 6 : i32
    %c8_i32_44 = arith.constant 8 : i32
    %150 = arith.muli %c6_i32, %c8_i32_44 : i32
    %151 = tpu.assume_multiple %150, 8 : i32
    %152 = arith.index_cast %151 : i32 to index
    %c0_45 = arith.constant 0 : index
    %153 = vector.load %arg14[%152, %c0_45] : memref<64x128xf32, #tpu.memory_space<vmem>>, vector<8x128xf32>
    %cst_46 = arith.constant dense<0.000000e+00> : vector<8x128xf32>
    %154 = tpu.matmul %147, %7, %cst_46 {dimension_numbers = #tpu.dot_dimension_numbers<[1], [0], [0], [1], [0, 0, 1, 1], [], []>} : vector<8x32xf32>, vector<32x128xf32>, vector<8x128xf32> -> vector<8x128xf32>
    %155 = arith.addf %153, %154 : vector<8x128xf32>
    %156 = arith.negf %155 : vector<8x128xf32>
    %157 = math.exp %156 : vector<8x128xf32>
    %cst_47 = arith.constant 1.000000e+00 : f32
    %158 = vector.broadcast %cst_47 : f32 to vector<8x128xf32>
    %159 = arith.addf %158, %157 : vector<8x128xf32>
    %160 = arith.divf %158, %159 : vector<8x128xf32>
    %161 = vector.extract_strided_slice %160 {offsets = [0, 0], sizes = [8, 32], strides = [1, 1]} : vector<8x128xf32> to vector<8x32xf32>
    %162 = vector.extract_strided_slice %160 {offsets = [0, 32], sizes = [8, 32], strides = [1, 1]} : vector<8x128xf32> to vector<8x32xf32>
    %163 = vector.extract_strided_slice %160 {offsets = [0, 96], sizes = [8, 32], strides = [1, 1]} : vector<8x128xf32> to vector<8x32xf32>
    %164 = vector.extract_strided_slice %155 {offsets = [0, 64], sizes = [8, 32], strides = [1, 1]} : vector<8x128xf32> to vector<8x32xf32>
    %165 = math.tanh %164 : vector<8x32xf32>
    %166 = arith.mulf %162, %145 : vector<8x32xf32>
    %167 = arith.mulf %161, %165 : vector<8x32xf32>
    %168 = arith.addf %166, %167 : vector<8x32xf32>
    %169 = math.tanh %168 : vector<8x32xf32>
    %170 = arith.mulf %163, %169 : vector<8x32xf32>
    %171 = arith.index_cast %151 : i32 to index
    %c0_48 = arith.constant 0 : index
    %172 = vector.load %arg15[%171, %c0_48] : memref<64x32xf32, #tpu.memory_space<vmem>>, vector<8x32xf32>
    tpu.vector_store %arg15[%171, %c0_48], %170 {strides = array<i32>} : memref<64x32xf32, #tpu.memory_space<vmem>>, vector<8x32xf32>,
    %c7_i32 = arith.constant 7 : i32
    %c8_i32_49 = arith.constant 8 : i32
    %173 = arith.muli %c7_i32, %c8_i32_49 : i32
    %174 = tpu.assume_multiple %173, 8 : i32
    %175 = arith.index_cast %174 : i32 to index
    %c0_50 = arith.constant 0 : index
    %176 = vector.load %arg14[%175, %c0_50] : memref<64x128xf32, #tpu.memory_space<vmem>>, vector<8x128xf32>
    %cst_51 = arith.constant dense<0.000000e+00> : vector<8x128xf32>
    %177 = tpu.matmul %170, %7, %cst_51 {dimension_numbers = #tpu.dot_dimension_numbers<[1], [0], [0], [1], [0, 0, 1, 1], [], []>} : vector<8x32xf32>, vector<32x128xf32>, vector<8x128xf32> -> vector<8x128xf32>
    %178 = arith.addf %176, %177 : vector<8x128xf32>
    %179 = arith.negf %178 : vector<8x128xf32>
    %180 = math.exp %179 : vector<8x128xf32>
    %cst_52 = arith.constant 1.000000e+00 : f32
    %181 = vector.broadcast %cst_52 : f32 to vector<8x128xf32>
    %182 = arith.addf %181, %180 : vector<8x128xf32>
    %183 = arith.divf %181, %182 : vector<8x128xf32>
    %184 = vector.extract_strided_slice %183 {offsets = [0, 0], sizes = [8, 32], strides = [1, 1]} : vector<8x128xf32> to vector<8x32xf32>
    %185 = vector.extract_strided_slice %183 {offsets = [0, 32], sizes = [8, 32], strides = [1, 1]} : vector<8x128xf32> to vector<8x32xf32>
    %186 = vector.extract_strided_slice %183 {offsets = [0, 96], sizes = [8, 32], strides = [1, 1]} : vector<8x128xf32> to vector<8x32xf32>
    %187 = vector.extract_strided_slice %178 {offsets = [0, 64], sizes = [8, 32], strides = [1, 1]} : vector<8x128xf32> to vector<8x32xf32>
    %188 = math.tanh %187 : vector<8x32xf32>
    %189 = arith.mulf %185, %168 : vector<8x32xf32>
    %190 = arith.mulf %184, %188 : vector<8x32xf32>
    %191 = arith.addf %189, %190 : vector<8x32xf32>
    %192 = math.tanh %191 : vector<8x32xf32>
    %193 = arith.mulf %186, %192 : vector<8x32xf32>
    %194 = arith.index_cast %174 : i32 to index
    %c0_53 = arith.constant 0 : index
    %195 = vector.load %arg15[%194, %c0_53] : memref<64x32xf32, #tpu.memory_space<vmem>>, vector<8x32xf32>
    tpu.vector_store %arg15[%194, %c0_53], %193 {strides = array<i32>} : memref<64x32xf32, #tpu.memory_space<vmem>>, vector<8x32xf32>,
    %c8_i32_54 = arith.constant 8 : i32
    %c0_55 = arith.constant 0 : index
    %c0_56 = arith.constant 0 : index
    %c0_57 = arith.constant 0 : index
    %196 = vector.load %arg12[%c0_55, %c0_56, %c0_57] : memref<2x8x32xf32, #tpu.memory_space<vmem>>, vector<1x8x32xf32>
    %197 = vector.shape_cast %196 : vector<1x8x32xf32> to vector<8x32xf32>
    %198 = vector.shape_cast %193 : vector<8x32xf32> to vector<1x8x32xf32>
    tpu.vector_store %arg12[%c0_55, %c0_56, %c0_57], %198 {strides = array<i32>} : memref<2x8x32xf32, #tpu.memory_space<vmem>>, vector<1x8x32xf32>,
    %c0_58 = arith.constant 0 : index
    %c0_59 = arith.constant 0 : index
    %c0_60 = arith.constant 0 : index
    %199 = vector.load %arg13[%c0_58, %c0_59, %c0_60] : memref<2x8x32xf32, #tpu.memory_space<vmem>>, vector<1x8x32xf32>
    %200 = vector.shape_cast %199 : vector<1x8x32xf32> to vector<8x32xf32>
    %201 = vector.shape_cast %191 : vector<8x32xf32> to vector<1x8x32xf32>
    tpu.vector_store %arg13[%c0_58, %c0_59, %c0_60], %201 {strides = array<i32>} : memref<2x8x32xf32, #tpu.memory_space<vmem>>, vector<1x8x32xf32>,
    %c0_61 = arith.constant 0 : index
    %c0_62 = arith.constant 0 : index
    %202 = vector.load %arg15[%c0_61, %c0_62] : memref<64x32xf32, #tpu.memory_space<vmem>>, vector<64x32xf32>
    %c0_63 = arith.constant 0 : index
    %c0_64 = arith.constant 0 : index
    %203 = vector.load %arg6[%c0_63, %c0_64] : memref<32x128xf32, #tpu.memory_space<vmem>>, vector<32x128xf32>
    %cst_65 = arith.constant dense<0.000000e+00> : vector<64x128xf32>
    %204 = tpu.matmul %202, %203, %cst_65 {dimension_numbers = #tpu.dot_dimension_numbers<[1], [0], [0], [1], [0, 0, 1, 1], [], []>} : vector<64x32xf32>, vector<32x128xf32>, vector<64x128xf32> -> vector<64x128xf32>
    %c0_66 = arith.constant 0 : index
    %c0_67 = arith.constant 0 : index
    %205 = vector.load %arg8[%c0_66, %c0_67] : memref<1x128xf32, #tpu.memory_space<vmem>>, vector<1x128xf32>
    %206 = vector.broadcast %205 : vector<1x128xf32> to vector<64x128xf32>
    %207 = arith.addf %204, %206 : vector<64x128xf32>
    %c0_68 = arith.constant 0 : index
    %c0_69 = arith.constant 0 : index
    %208 = vector.load %arg14[%c0_68, %c0_69] : memref<64x128xf32, #tpu.memory_space<vmem>>, vector<64x128xf32>
    tpu.vector_store %arg14[%c0_68, %c0_69], %207 {strides = array<i32>} : memref<64x128xf32, #tpu.memory_space<vmem>>, vector<64x128xf32>,
    %c0_70 = arith.constant 0 : index
    %c0_71 = arith.constant 0 : index
    %209 = vector.load %arg7[%c0_70, %c0_71] : memref<32x128xf32, #tpu.memory_space<vmem>>, vector<32x128xf32>
    %c1 = arith.constant 1 : index
    %c0_72 = arith.constant 0 : index
    %c0_73 = arith.constant 0 : index
    %210 = vector.load %arg1[%c1, %c0_72, %c0_73] : memref<2x8x32xf32, #tpu.memory_space<vmem>>, vector<1x8x32xf32>
    %211 = vector.shape_cast %210 : vector<1x8x32xf32> to vector<8x32xf32>
    %c1_74 = arith.constant 1 : index
    %c0_75 = arith.constant 0 : index
    %c0_76 = arith.constant 0 : index
    %212 = vector.load %arg2[%c1_74, %c0_75, %c0_76] : memref<2x8x32xf32, #tpu.memory_space<vmem>>, vector<1x8x32xf32>
    %213 = vector.shape_cast %212 : vector<1x8x32xf32> to vector<8x32xf32>
    %c0_i32_77 = arith.constant 0 : i32
    %c8_i32_78 = arith.constant 8 : i32
    %214 = arith.muli %c0_i32_77, %c8_i32_78 : i32
    %215 = tpu.assume_multiple %214, 8 : i32
    %216 = arith.index_cast %215 : i32 to index
    %c0_79 = arith.constant 0 : index
    %217 = vector.load %arg14[%216, %c0_79] : memref<64x128xf32, #tpu.memory_space<vmem>>, vector<8x128xf32>
    %cst_80 = arith.constant dense<0.000000e+00> : vector<8x128xf32>
    %218 = tpu.matmul %211, %209, %cst_80 {dimension_numbers = #tpu.dot_dimension_numbers<[1], [0], [0], [1], [0, 0, 1, 1], [], []>} : vector<8x32xf32>, vector<32x128xf32>, vector<8x128xf32> -> vector<8x128xf32>
    %219 = arith.addf %217, %218 : vector<8x128xf32>
    %220 = arith.negf %219 : vector<8x128xf32>
    %221 = math.exp %220 : vector<8x128xf32>
    %cst_81 = arith.constant 1.000000e+00 : f32
    %222 = vector.broadcast %cst_81 : f32 to vector<8x128xf32>
    %223 = arith.addf %222, %221 : vector<8x128xf32>
    %224 = arith.divf %222, %223 : vector<8x128xf32>
    %225 = vector.extract_strided_slice %224 {offsets = [0, 0], sizes = [8, 32], strides = [1, 1]} : vector<8x128xf32> to vector<8x32xf32>
    %226 = vector.extract_strided_slice %224 {offsets = [0, 32], sizes = [8, 32], strides = [1, 1]} : vector<8x128xf32> to vector<8x32xf32>
    %227 = vector.extract_strided_slice %224 {offsets = [0, 96], sizes = [8, 32], strides = [1, 1]} : vector<8x128xf32> to vector<8x32xf32>
    %228 = vector.extract_strided_slice %219 {offsets = [0, 64], sizes = [8, 32], strides = [1, 1]} : vector<8x128xf32> to vector<8x32xf32>
    %229 = math.tanh %228 : vector<8x32xf32>
    %230 = arith.mulf %226, %213 : vector<8x32xf32>
    %231 = arith.mulf %225, %229 : vector<8x32xf32>
    %232 = arith.addf %230, %231 : vector<8x32xf32>
    %233 = math.tanh %232 : vector<8x32xf32>
    %234 = arith.mulf %227, %233 : vector<8x32xf32>
    %c1_i32_82 = arith.constant 1 : i32
    %c8_i32_83 = arith.constant 8 : i32
    %235 = arith.muli %c1_i32_82, %c8_i32_83 : i32
    %236 = tpu.assume_multiple %235, 8 : i32
    %237 = arith.index_cast %236 : i32 to index
    %c0_84 = arith.constant 0 : index
    %238 = vector.load %arg14[%237, %c0_84] : memref<64x128xf32, #tpu.memory_space<vmem>>, vector<8x128xf32>
    %cst_85 = arith.constant dense<0.000000e+00> : vector<8x128xf32>
    %239 = tpu.matmul %234, %209, %cst_85 {dimension_numbers = #tpu.dot_dimension_numbers<[1], [0], [0], [1], [0, 0, 1, 1], [], []>} : vector<8x32xf32>, vector<32x128xf32>, vector<8x128xf32> -> vector<8x128xf32>
    %240 = arith.addf %238, %239 : vector<8x128xf32>
    %241 = arith.negf %240 : vector<8x128xf32>
    %242 = math.exp %241 : vector<8x128xf32>
    %cst_86 = arith.constant 1.000000e+00 : f32
    %243 = vector.broadcast %cst_86 : f32 to vector<8x128xf32>
    %244 = arith.addf %243, %242 : vector<8x128xf32>
    %245 = arith.divf %243, %244 : vector<8x128xf32>
    %246 = vector.extract_strided_slice %245 {offsets = [0, 0], sizes = [8, 32], strides = [1, 1]} : vector<8x128xf32> to vector<8x32xf32>
    %247 = vector.extract_strided_slice %245 {offsets = [0, 32], sizes = [8, 32], strides = [1, 1]} : vector<8x128xf32> to vector<8x32xf32>
    %248 = vector.extract_strided_slice %245 {offsets = [0, 96], sizes = [8, 32], strides = [1, 1]} : vector<8x128xf32> to vector<8x32xf32>
    %249 = vector.extract_strided_slice %240 {offsets = [0, 64], sizes = [8, 32], strides = [1, 1]} : vector<8x128xf32> to vector<8x32xf32>
    %250 = math.tanh %249 : vector<8x32xf32>
    %251 = arith.mulf %247, %232 : vector<8x32xf32>
    %252 = arith.mulf %246, %250 : vector<8x32xf32>
    %253 = arith.addf %251, %252 : vector<8x32xf32>
    %254 = math.tanh %253 : vector<8x32xf32>
    %255 = arith.mulf %248, %254 : vector<8x32xf32>
    %c2_i32_87 = arith.constant 2 : i32
    %c8_i32_88 = arith.constant 8 : i32
    %256 = arith.muli %c2_i32_87, %c8_i32_88 : i32
    %257 = tpu.assume_multiple %256, 8 : i32
    %258 = arith.index_cast %257 : i32 to index
    %c0_89 = arith.constant 0 : index
    %259 = vector.load %arg14[%258, %c0_89] : memref<64x128xf32, #tpu.memory_space<vmem>>, vector<8x128xf32>
    %cst_90 = arith.constant dense<0.000000e+00> : vector<8x128xf32>
    %260 = tpu.matmul %255, %209, %cst_90 {dimension_numbers = #tpu.dot_dimension_numbers<[1], [0], [0], [1], [0, 0, 1, 1], [], []>} : vector<8x32xf32>, vector<32x128xf32>, vector<8x128xf32> -> vector<8x128xf32>
    %261 = arith.addf %259, %260 : vector<8x128xf32>
    %262 = arith.negf %261 : vector<8x128xf32>
    %263 = math.exp %262 : vector<8x128xf32>
    %cst_91 = arith.constant 1.000000e+00 : f32
    %264 = vector.broadcast %cst_91 : f32 to vector<8x128xf32>
    %265 = arith.addf %264, %263 : vector<8x128xf32>
    %266 = arith.divf %264, %265 : vector<8x128xf32>
    %267 = vector.extract_strided_slice %266 {offsets = [0, 0], sizes = [8, 32], strides = [1, 1]} : vector<8x128xf32> to vector<8x32xf32>
    %268 = vector.extract_strided_slice %266 {offsets = [0, 32], sizes = [8, 32], strides = [1, 1]} : vector<8x128xf32> to vector<8x32xf32>
    %269 = vector.extract_strided_slice %266 {offsets = [0, 96], sizes = [8, 32], strides = [1, 1]} : vector<8x128xf32> to vector<8x32xf32>
    %270 = vector.extract_strided_slice %261 {offsets = [0, 64], sizes = [8, 32], strides = [1, 1]} : vector<8x128xf32> to vector<8x32xf32>
    %271 = math.tanh %270 : vector<8x32xf32>
    %272 = arith.mulf %268, %253 : vector<8x32xf32>
    %273 = arith.mulf %267, %271 : vector<8x32xf32>
    %274 = arith.addf %272, %273 : vector<8x32xf32>
    %275 = math.tanh %274 : vector<8x32xf32>
    %276 = arith.mulf %269, %275 : vector<8x32xf32>
    %c3_i32_92 = arith.constant 3 : i32
    %c8_i32_93 = arith.constant 8 : i32
    %277 = arith.muli %c3_i32_92, %c8_i32_93 : i32
    %278 = tpu.assume_multiple %277, 8 : i32
    %279 = arith.index_cast %278 : i32 to index
    %c0_94 = arith.constant 0 : index
    %280 = vector.load %arg14[%279, %c0_94] : memref<64x128xf32, #tpu.memory_space<vmem>>, vector<8x128xf32>
    %cst_95 = arith.constant dense<0.000000e+00> : vector<8x128xf32>
    %281 = tpu.matmul %276, %209, %cst_95 {dimension_numbers = #tpu.dot_dimension_numbers<[1], [0], [0], [1], [0, 0, 1, 1], [], []>} : vector<8x32xf32>, vector<32x128xf32>, vector<8x128xf32> -> vector<8x128xf32>
    %282 = arith.addf %280, %281 : vector<8x128xf32>
    %283 = arith.negf %282 : vector<8x128xf32>
    %284 = math.exp %283 : vector<8x128xf32>
    %cst_96 = arith.constant 1.000000e+00 : f32
    %285 = vector.broadcast %cst_96 : f32 to vector<8x128xf32>
    %286 = arith.addf %285, %284 : vector<8x128xf32>
    %287 = arith.divf %285, %286 : vector<8x128xf32>
    %288 = vector.extract_strided_slice %287 {offsets = [0, 0], sizes = [8, 32], strides = [1, 1]} : vector<8x128xf32> to vector<8x32xf32>
    %289 = vector.extract_strided_slice %287 {offsets = [0, 32], sizes = [8, 32], strides = [1, 1]} : vector<8x128xf32> to vector<8x32xf32>
    %290 = vector.extract_strided_slice %287 {offsets = [0, 96], sizes = [8, 32], strides = [1, 1]} : vector<8x128xf32> to vector<8x32xf32>
    %291 = vector.extract_strided_slice %282 {offsets = [0, 64], sizes = [8, 32], strides = [1, 1]} : vector<8x128xf32> to vector<8x32xf32>
    %292 = math.tanh %291 : vector<8x32xf32>
    %293 = arith.mulf %289, %274 : vector<8x32xf32>
    %294 = arith.mulf %288, %292 : vector<8x32xf32>
    %295 = arith.addf %293, %294 : vector<8x32xf32>
    %296 = math.tanh %295 : vector<8x32xf32>
    %297 = arith.mulf %290, %296 : vector<8x32xf32>
    %c4_i32_97 = arith.constant 4 : i32
    %c8_i32_98 = arith.constant 8 : i32
    %298 = arith.muli %c4_i32_97, %c8_i32_98 : i32
    %299 = tpu.assume_multiple %298, 8 : i32
    %300 = arith.index_cast %299 : i32 to index
    %c0_99 = arith.constant 0 : index
    %301 = vector.load %arg14[%300, %c0_99] : memref<64x128xf32, #tpu.memory_space<vmem>>, vector<8x128xf32>
    %cst_100 = arith.constant dense<0.000000e+00> : vector<8x128xf32>
    %302 = tpu.matmul %297, %209, %cst_100 {dimension_numbers = #tpu.dot_dimension_numbers<[1], [0], [0], [1], [0, 0, 1, 1], [], []>} : vector<8x32xf32>, vector<32x128xf32>, vector<8x128xf32> -> vector<8x128xf32>
    %303 = arith.addf %301, %302 : vector<8x128xf32>
    %304 = arith.negf %303 : vector<8x128xf32>
    %305 = math.exp %304 : vector<8x128xf32>
    %cst_101 = arith.constant 1.000000e+00 : f32
    %306 = vector.broadcast %cst_101 : f32 to vector<8x128xf32>
    %307 = arith.addf %306, %305 : vector<8x128xf32>
    %308 = arith.divf %306, %307 : vector<8x128xf32>
    %309 = vector.extract_strided_slice %308 {offsets = [0, 0], sizes = [8, 32], strides = [1, 1]} : vector<8x128xf32> to vector<8x32xf32>
    %310 = vector.extract_strided_slice %308 {offsets = [0, 32], sizes = [8, 32], strides = [1, 1]} : vector<8x128xf32> to vector<8x32xf32>
    %311 = vector.extract_strided_slice %308 {offsets = [0, 96], sizes = [8, 32], strides = [1, 1]} : vector<8x128xf32> to vector<8x32xf32>
    %312 = vector.extract_strided_slice %303 {offsets = [0, 64], sizes = [8, 32], strides = [1, 1]} : vector<8x128xf32> to vector<8x32xf32>
    %313 = math.tanh %312 : vector<8x32xf32>
    %314 = arith.mulf %310, %295 : vector<8x32xf32>
    %315 = arith.mulf %309, %313 : vector<8x32xf32>
    %316 = arith.addf %314, %315 : vector<8x32xf32>
    %317 = math.tanh %316 : vector<8x32xf32>
    %318 = arith.mulf %311, %317 : vector<8x32xf32>
    %c5_i32_102 = arith.constant 5 : i32
    %c8_i32_103 = arith.constant 8 : i32
    %319 = arith.muli %c5_i32_102, %c8_i32_103 : i32
    %320 = tpu.assume_multiple %319, 8 : i32
    %321 = arith.index_cast %320 : i32 to index
    %c0_104 = arith.constant 0 : index
    %322 = vector.load %arg14[%321, %c0_104] : memref<64x128xf32, #tpu.memory_space<vmem>>, vector<8x128xf32>
    %cst_105 = arith.constant dense<0.000000e+00> : vector<8x128xf32>
    %323 = tpu.matmul %318, %209, %cst_105 {dimension_numbers = #tpu.dot_dimension_numbers<[1], [0], [0], [1], [0, 0, 1, 1], [], []>} : vector<8x32xf32>, vector<32x128xf32>, vector<8x128xf32> -> vector<8x128xf32>
    %324 = arith.addf %322, %323 : vector<8x128xf32>
    %325 = arith.negf %324 : vector<8x128xf32>
    %326 = math.exp %325 : vector<8x128xf32>
    %cst_106 = arith.constant 1.000000e+00 : f32
    %327 = vector.broadcast %cst_106 : f32 to vector<8x128xf32>
    %328 = arith.addf %327, %326 : vector<8x128xf32>
    %329 = arith.divf %327, %328 : vector<8x128xf32>
    %330 = vector.extract_strided_slice %329 {offsets = [0, 0], sizes = [8, 32], strides = [1, 1]} : vector<8x128xf32> to vector<8x32xf32>
    %331 = vector.extract_strided_slice %329 {offsets = [0, 32], sizes = [8, 32], strides = [1, 1]} : vector<8x128xf32> to vector<8x32xf32>
    %332 = vector.extract_strided_slice %329 {offsets = [0, 96], sizes = [8, 32], strides = [1, 1]} : vector<8x128xf32> to vector<8x32xf32>
    %333 = vector.extract_strided_slice %324 {offsets = [0, 64], sizes = [8, 32], strides = [1, 1]} : vector<8x128xf32> to vector<8x32xf32>
    %334 = math.tanh %333 : vector<8x32xf32>
    %335 = arith.mulf %331, %316 : vector<8x32xf32>
    %336 = arith.mulf %330, %334 : vector<8x32xf32>
    %337 = arith.addf %335, %336 : vector<8x32xf32>
    %338 = math.tanh %337 : vector<8x32xf32>
    %339 = arith.mulf %332, %338 : vector<8x32xf32>
    %c6_i32_107 = arith.constant 6 : i32
    %c8_i32_108 = arith.constant 8 : i32
    %340 = arith.muli %c6_i32_107, %c8_i32_108 : i32
    %341 = tpu.assume_multiple %340, 8 : i32
    %342 = arith.index_cast %341 : i32 to index
    %c0_109 = arith.constant 0 : index
    %343 = vector.load %arg14[%342, %c0_109] : memref<64x128xf32, #tpu.memory_space<vmem>>, vector<8x128xf32>
    %cst_110 = arith.constant dense<0.000000e+00> : vector<8x128xf32>
    %344 = tpu.matmul %339, %209, %cst_110 {dimension_numbers = #tpu.dot_dimension_numbers<[1], [0], [0], [1], [0, 0, 1, 1], [], []>} : vector<8x32xf32>, vector<32x128xf32>, vector<8x128xf32> -> vector<8x128xf32>
    %345 = arith.addf %343, %344 : vector<8x128xf32>
    %346 = arith.negf %345 : vector<8x128xf32>
    %347 = math.exp %346 : vector<8x128xf32>
    %cst_111 = arith.constant 1.000000e+00 : f32
    %348 = vector.broadcast %cst_111 : f32 to vector<8x128xf32>
    %349 = arith.addf %348, %347 : vector<8x128xf32>
    %350 = arith.divf %348, %349 : vector<8x128xf32>
    %351 = vector.extract_strided_slice %350 {offsets = [0, 0], sizes = [8, 32], strides = [1, 1]} : vector<8x128xf32> to vector<8x32xf32>
    %352 = vector.extract_strided_slice %350 {offsets = [0, 32], sizes = [8, 32], strides = [1, 1]} : vector<8x128xf32> to vector<8x32xf32>
    %353 = vector.extract_strided_slice %350 {offsets = [0, 96], sizes = [8, 32], strides = [1, 1]} : vector<8x128xf32> to vector<8x32xf32>
    %354 = vector.extract_strided_slice %345 {offsets = [0, 64], sizes = [8, 32], strides = [1, 1]} : vector<8x128xf32> to vector<8x32xf32>
    %355 = math.tanh %354 : vector<8x32xf32>
    %356 = arith.mulf %352, %337 : vector<8x32xf32>
    %357 = arith.mulf %351, %355 : vector<8x32xf32>
    %358 = arith.addf %356, %357 : vector<8x32xf32>
    %359 = math.tanh %358 : vector<8x32xf32>
    %360 = arith.mulf %353, %359 : vector<8x32xf32>
    %c7_i32_112 = arith.constant 7 : i32
    %c8_i32_113 = arith.constant 8 : i32
    %361 = arith.muli %c7_i32_112, %c8_i32_113 : i32
    %362 = tpu.assume_multiple %361, 8 : i32
    %363 = arith.index_cast %362 : i32 to index
    %c0_114 = arith.constant 0 : index
    %364 = vector.load %arg14[%363, %c0_114] : memref<64x128xf32, #tpu.memory_space<vmem>>, vector<8x128xf32>
    %cst_115 = arith.constant dense<0.000000e+00> : vector<8x128xf32>
    %365 = tpu.matmul %360, %209, %cst_115 {dimension_numbers = #tpu.dot_dimension_numbers<[1], [0], [0], [1], [0, 0, 1, 1], [], []>} : vector<8x32xf32>, vector<32x128xf32>, vector<8x128xf32> -> vector<8x128xf32>
    %366 = arith.addf %364, %365 : vector<8x128xf32>
    %367 = arith.negf %366 : vector<8x128xf32>
    %368 = math.exp %367 : vector<8x128xf32>
    %cst_116 = arith.constant 1.000000e+00 : f32
    %369 = vector.broadcast %cst_116 : f32 to vector<8x128xf32>
    %370 = arith.addf %369, %368 : vector<8x128xf32>
    %371 = arith.divf %369, %370 : vector<8x128xf32>
    %372 = vector.extract_strided_slice %371 {offsets = [0, 0], sizes = [8, 32], strides = [1, 1]} : vector<8x128xf32> to vector<8x32xf32>
    %373 = vector.extract_strided_slice %371 {offsets = [0, 32], sizes = [8, 32], strides = [1, 1]} : vector<8x128xf32> to vector<8x32xf32>
    %374 = vector.extract_strided_slice %371 {offsets = [0, 96], sizes = [8, 32], strides = [1, 1]} : vector<8x128xf32> to vector<8x32xf32>
    %375 = vector.extract_strided_slice %366 {offsets = [0, 64], sizes = [8, 32], strides = [1, 1]} : vector<8x128xf32> to vector<8x32xf32>
    %376 = math.tanh %375 : vector<8x32xf32>
    %377 = arith.mulf %373, %358 : vector<8x32xf32>
    %378 = arith.mulf %372, %376 : vector<8x32xf32>
    %379 = arith.addf %377, %378 : vector<8x32xf32>
    %380 = math.tanh %379 : vector<8x32xf32>
    %381 = arith.mulf %374, %380 : vector<8x32xf32>
    %c8_i32_117 = arith.constant 8 : i32
    %c1_118 = arith.constant 1 : index
    %c0_119 = arith.constant 0 : index
    %c0_120 = arith.constant 0 : index
    %382 = vector.load %arg12[%c1_118, %c0_119, %c0_120] : memref<2x8x32xf32, #tpu.memory_space<vmem>>, vector<1x8x32xf32>
    %383 = vector.shape_cast %382 : vector<1x8x32xf32> to vector<8x32xf32>
    %384 = vector.shape_cast %381 : vector<8x32xf32> to vector<1x8x32xf32>
    tpu.vector_store %arg12[%c1_118, %c0_119, %c0_120], %384 {strides = array<i32>} : memref<2x8x32xf32, #tpu.memory_space<vmem>>, vector<1x8x32xf32>,
    %c1_121 = arith.constant 1 : index
    %c0_122 = arith.constant 0 : index
    %c0_123 = arith.constant 0 : index
    %385 = vector.load %arg13[%c1_121, %c0_122, %c0_123] : memref<2x8x32xf32, #tpu.memory_space<vmem>>, vector<1x8x32xf32>
    %386 = vector.shape_cast %385 : vector<1x8x32xf32> to vector<8x32xf32>
    %387 = vector.shape_cast %379 : vector<8x32xf32> to vector<1x8x32xf32>
    tpu.vector_store %arg13[%c1_121, %c0_122, %c0_123], %387 {strides = array<i32>} : memref<2x8x32xf32, #tpu.memory_space<vmem>>, vector<1x8x32xf32>,
    %c0_124 = arith.constant 0 : index
    %c0_125 = arith.constant 0 : index
    %388 = vector.load %arg9[%c0_124, %c0_125] : memref<32x128xf32, #tpu.memory_space<vmem>>, vector<32x128xf32>
    %cst_126 = arith.constant dense<0.000000e+00> : vector<8x128xf32>
    %389 = tpu.matmul %381, %388, %cst_126 {dimension_numbers = #tpu.dot_dimension_numbers<[1], [0], [0], [1], [0, 0, 1, 1], [], []>} : vector<8x32xf32>, vector<32x128xf32>, vector<8x128xf32> -> vector<8x128xf32>
    %c0_127 = arith.constant 0 : index
    %c0_128 = arith.constant 0 : index
    %390 = vector.load %arg10[%c0_127, %c0_128] : memref<1x128xf32, #tpu.memory_space<vmem>>, vector<1x128xf32>
    %391 = vector.broadcast %390 : vector<1x128xf32> to vector<8x128xf32>
    %392 = arith.addf %389, %391 : vector<8x128xf32>
    %c0_129 = arith.constant 0 : index
    %c0_130 = arith.constant 0 : index
    %393 = vector.load %arg11[%c0_129, %c0_130] : memref<8x128xf32, #tpu.memory_space<vmem>>, vector<8x128xf32>
    tpu.vector_store %arg11[%c0_129, %c0_130], %392 {strides = array<i32>} : memref<8x128xf32, #tpu.memory_space<vmem>>, vector<8x128xf32>,
    return
  }
}

</mosaic_0001>

<bundles_post_ra>
// kernel: tpu_custom_call.1
= control target key start
LH: loop header
LB: loop body
LE: loop exit
PB: predicated region body
PF: predicated region fallthrough
CT: control target
= control target key end

     0   :  { %19 = vsyncpa [#allocation5], 0  ;;  %s3580_s0 = inlined_call_operand.vmem [shape: f32[64,16], index: 0, kind: input, shape index: {}]   ;;  %s3581_s1 = inlined_call_operand.hbm [shape: f32[2,8,32], index: 1, kind: input, shape index: {}]   ;;  %s3582_s2 = inlined_call_operand.hbm [shape: f32[2,8,32], index: 2, kind: input, shape index: {}]   ;;  %s3583_s3 = inlined_call_operand.hbm [shape: f32[16,128], index: 3, kind: input, shape index: {}]   ;;  %s3584_s4 = inlined_call_operand.vmem [shape: f32[32,128], index: 4, kind: input, shape index: {}]   ;;  %s3585_s5 = inlined_call_operand.vmem [shape: f32[1,128], index: 5, kind: input, shape index: {}]   ;;  %s3586_s6 = inlined_call_operand.vmem [shape: f32[32,128], index: 6, kind: input, shape index: {}]   ;;  %s3587_s7 = inlined_call_operand.vmem [shape: f32[32,128], index: 7, kind: input, shape index: {}]   ;;  %s3588_s8 = inlined_call_operand.vmem [shape: f32[1,128], index: 8, kind: input, shape index: {}]   ;;  %s3589_s9 = inlined_call_operand.hbm [shape: f32[32,128], index: 9, kind: input, shape index: {}]   ;;  %s3590_s10 = inlined_call_operand.vmem [shape: f32[1,128], index: 10, kind: input, shape index: {}]   ;;  %s3591_s11 = inlined_call_operand.hbm [shape: f32[8,128], index: 11, kind: output, shape index: {0}]   ;;  %s3592_s12 = inlined_call_operand.hbm [shape: f32[2,8,32], index: 12, kind: output, shape index: {1}]   ;;  %s3593_s13 = inlined_call_operand.hbm [shape: f32[2,8,32], index: 13, kind: output, shape index: {2}]  }
   0x1   :  { %20 = vsyncpa [#allocation8], 0 }
   0x2   :  { %21 = vsyncpa [#allocation11], 0 }
   0x3   :  { %22 = vsyncpa [#allocation6], 0 }
   0x4   :  { %23 = vsyncpa [#allocation14], 0  ;;  %s3030_s25 = smov [#allocation7]   ;;  %s3031_s27 = smov [#allocation4]  }
   0x5   :  { %s43_s26 = sshll.u32 %s3030_s25, 4  ;;  %s31_s28 = sshll.u32 %s3031_s27, 4  ;;  %s44_s26 = int_to_ptr.vmem [resolvable:$true] %s43_s26  ;;  %s3115_s28 = int_to_ptr.vmem [resolvable:$true] %s31_s28 }
   0x6   :  { %s2866_s14 = scalar_lea.hbm %s3582_s2, 256 }
   0x7   :  { %p2867_p0 = scmp.ne.s32.totalorder %s3582_s2, %s2866_s14  ;;  %p2870_p1 = scmp.lt.u32.totalorder %s2866_s14, %s3582_s2 }
   0x9   :  { %p2872_p2 = pnand %p2870_p1, %p2867_p0 }
   0xb   :  { %2875 = shalt.err (!%p2872_p2)
}
   0xc   :  { %s2876_s19 = scalar_lea.vmem %s44_s26, 256  ;;  %p2881_p4 = scmp.lt.s32.totalorder %s44_s26, %s44_s26 }
   0xd   :  { %p2877_p3 = scmp.ne.s32.totalorder %s44_s26, %s2876_s19  ;;  %p2882_p5 = scmp.lt.s32.totalorder %s2876_s19, %s2876_s19 }
   0xf   :  { %p2883_p6 = por %p2882_p5, %p2881_p4 }
  0x11   :  { %p2884_p7 = pnand %p2883_p6, %p2877_p3 }
  0x13   :  { %2887 = shalt.err (!%p2884_p7)
}
  0x14   :  { %s3032_s20 = smov 128   ;;  %s3033_s21 = smov 8  }
  0x15   :  { %49 = dma.hbm_to_vmem [thread:$0]  %s3582_s2, 256, %s44_s26, [#allocation8], %s3032_s20, %s3032_s20, %s3033_s21  }
  0x16   :  { %s2888_s27 = scalar_lea.hbm %s3581_s1, 256 }
  0x17   :  { %p2889_p8 = scmp.ne.s32.totalorder %s3581_s1, %s2888_s27  ;;  %p2892_p9 = scmp.lt.u32.totalorder %s2888_s27, %s3581_s1 }
  0x19   :  { %p2894_p10 = pnand %p2892_p9, %p2889_p8 }
  0x1b   :  { %2897 = shalt.err (!%p2894_p10)
}
  0x1c   :  { %s2898_s16 = scalar_lea.vmem %s3115_s28, 256  ;;  %p2903_p12 = scmp.lt.s32.totalorder %s3115_s28, %s3115_s28 }
  0x1d   :  { %p2899_p11 = scmp.ne.s32.totalorder %s3115_s28, %s2898_s16  ;;  %p2904_p13 = scmp.lt.s32.totalorder %s2898_s16, %s2898_s16 }
  0x1f   :  { %p2905_p0 = por %p2904_p13, %p2903_p12 }
  0x21   :  { %p2906_p1 = pnand %p2905_p0, %p2899_p11 }
  0x23   :  { %2909 = shalt.err (!%p2906_p1)
}
  0x24   :  { %37 = dma.hbm_to_vmem [thread:$0]  %s3581_s1, 256, %s3115_s28, [#allocation5], %s3032_s20, %s3032_s20, %s3033_s21  }
  0x25   :  { %s3034_s17 = smov [#allocation9]   ;;  %s3035_s19 = smov [#allocation10]  }
  0x26   :  { %s55_s18 = sshll.u32 %s3034_s17, 4  ;;  %s77_s22 = sshll.u32 %s3035_s19, 4  ;;  %s56_s18 = int_to_ptr.vmem [resolvable:$true] %s55_s18  ;;  %s3152_s22 = int_to_ptr.vmem [resolvable:$true] %s77_s22 }
  0x27   :  { %s2910_s25 = scalar_lea.hbm %s3583_s3, 256 }
  0x28   :  { %p2911_p2 = scmp.ne.s32.totalorder %s3583_s3, %s2910_s25  ;;  %p2914_p3 = scmp.lt.u32.totalorder %s2910_s25, %s3583_s3 }
  0x2a   :  { %p2916_p4 = pnand %p2914_p3, %p2911_p2 }
  0x2c   :  { %2919 = shalt.err (!%p2916_p4)
}
  0x2d   :  { %s2920_s1 = scalar_lea.vmem %s56_s18, 256  ;;  %p2925_p6 = scmp.lt.s32.totalorder %s56_s18, %s56_s18 }
  0x2e   :  { %p2921_p5 = scmp.ne.s32.totalorder %s56_s18, %s2920_s1  ;;  %p2926_p7 = scmp.lt.s32.totalorder %s2920_s1, %s2920_s1 }
  0x30   :  { %p2927_p8 = por %p2926_p7, %p2925_p6 }
  0x32   :  { %p2928_p9 = pnand %p2927_p8, %p2921_p5 }
  0x34   :  { %2931 = shalt.err (!%p2928_p9)
}
  0x35   :  { %61 = dma.hbm_to_vmem [thread:$0]  %s3583_s3, 256, %s56_s18, [#allocation8], %s3032_s20, %s3032_s20, %s3033_s21  }
  0x36   :  { %s2932_s26 = scalar_lea.hbm %s3589_s9, 512 }
  0x37   :  { %p2933_p10 = scmp.ne.s32.totalorder %s3589_s9, %s2932_s26  ;;  %p2936_p11 = scmp.lt.u32.totalorder %s2932_s26, %s3589_s9 }
  0x39   :  { %p2938_p12 = pnand %p2936_p11, %p2933_p10 }
  0x3b   :  { %2941 = shalt.err (!%p2938_p12)
}
  0x3c   :  { %s2942_s25 = scalar_lea.vmem %s3152_s22, 512  ;;  %p2947_p0 = scmp.lt.s32.totalorder %s3152_s22, %s3152_s22 }
  0x3d   :  { %p2943_p13 = scmp.ne.s32.totalorder %s3152_s22, %s2942_s25  ;;  %p2948_p1 = scmp.lt.s32.totalorder %s2942_s25, %s2942_s25 }
  0x3f   :  { %p2949_p2 = por %p2948_p1, %p2947_p0 }
  0x41   :  { %p2950_p3 = pnand %p2949_p2, %p2943_p13 }
  0x43   :  { %2953 = shalt.err (!%p2950_p3)
}
  0x44   :  { %83 = dma.hbm_to_vmem [thread:$0]  %s3589_s9, 512, %s3152_s22, [#allocation11], %s3032_s20, %s3032_s20, %s3033_s21  }
  0x45   :  { %3020 = dma.done.wait [#allocation5], 256  }
  0x46   :  { %3021 = vsyncadd [#allocation5], 4294967040 }
  0x47   :  { %3022 = dma.done.wait [#allocation8], 512  }
  0x48   :  { %3023 = vsyncadd [#allocation8], 4294966784 }
  0x49   :  { %3024 = dma.done.wait [#allocation11], 512  }
  0x4a   :  { %3025 = vsyncadd [#allocation11], 4294966784  ;;  %v3036_v0 = vmov 0.0|0.0   ;;  %vm3037_vm0 = vmmov 0   ;;  %v3038_v1 = vmov 0.0   ;;  %vm115_vm1 = vcmask 130048  }
  0x4b   :  { %2613 = vmatprep.subr.bf16.mxu1 %v3036_v0  ;;  %2410 = vmatprep.mubr.msk.f32.mxu1 %vm3037_vm0, %v3038_v1  ;;  %v106_v2 = vld [vmem:[#allocation9] sm:$0xff]  ;;  %v107_v3 = vld [vmem:[#allocation9 + $0x8] sm:$0xff]  ;;  %v255_v9 = vld [vmem:[%s3584_s4 + $0x10] sm:$0xff]  ;;  %vm260_vm2 = vcmask 261120   ;;  %s3039_s19 = smov 64   ;;  %s3040_s23 = smov 32  }
  0x4c   :  { %v253_v4 = vld [vmem:[%s3584_s4] sm:$0xff]  ;;  %v2609_v5 = vpack.c.bf16 %v107_v3, %v106_v2  ;;  %v254_v6 = vld [vmem:[%s3584_s4 + $0x8] sm:$0xff]  ;;  %v256_v10 = vld [vmem:[%s3584_s4 + $0x18] sm:$0xff] }
  0x4d   :  { %v98_v7 = vld [vmem:[%s3580_s0] sm:$0xff]  ;;  %v3201_v8 = vpack.c.bf16 %v254_v6, %v253_v4  ;;  %v99_v11 = vld [vmem:[%s3580_s0 + $0x8] sm:$0xff]  ;;  %v3214_v12 = vpack.c.bf16 %v256_v10, %v255_v9  ;;  %v258_v22 = vld [vmem:[#allocation7] sm:$0xff] }
  0x4e   :  { %2390 = vmatprep.mubr.msk.f32.mxu0 %vm115_vm1, %v98_v7  ;;  %2610 = vmatprep.subr.bf16.mxu0 %v2609_v5  ;;  %v257_v13 = vld [vmem:[#allocation4] sm:$0xff]  ;;  %v100_v51 = vld [vmem:[%s3580_s0 + $0x10] sm:$0xff]  ;;  %v101_v52 = vld [vmem:[%s3580_s0 + $0x18] sm:$0xff] }
  0x4f   :  { %2615 = vmatpush3.bf16.msra.mxu1 %v3201_v8  ;;  %2612 = vmatpush3.bf16.msra.mxu0 %v2609_v5  ;;  %v3235_v14 = vld [vmem:[%s3585_s5] ss:$0 sm:$0xff]  ;;  %v103_v54 = vld [vmem:[%s3580_s0 + $0x28] sm:$0xff]  ;;  %v104_v55 = vld [vmem:[%s3580_s0 + $0x30] sm:$0xff] }
  0x50   :  { %2616 = vmatprep.subr.bf16.mxu1 %v3036_v0  ;;  %2625 = vmatprep.subr.bf16.mxu0 %v3036_v0  ;;  %v102_v53 = vld [vmem:[%s3580_s0 + $0x20] sm:$0xff]  ;;  %v105_v56 = vld [vmem:[%s3580_s0 + $0x38] sm:$0xff] }
  0x52   :  { %2391 = vmatmul.mubr.msk.f32.vlgmr.msra.gmra.mrb[0].mxu0 %vm115_vm1, %v99_v11 }
  0x53   :  { %2618 = vmatpush3.bf16.msra.mxu1 %v3214_v12  ;;  %2627 = vmatpush3.bf16.msra.mxu0 %v3201_v8 }
  0x54   :  { %2619 = vmatprep.subr.bf16.mxu1 %v3036_v0  ;;  %2628 = vmatprep.subr.bf16.mxu0 %v3036_v0 }
  0x55   :  { %2393 = vmatprep.mubr.msk.f32.mxu0 %vm115_vm1, %v100_v51 }
  0x56   :  { %2411 = vmatmul.mubr.msk.f32.vlgmr.msra.gmra.mrb[0].mxu1 %vm260_vm2, %v257_v13  ;;  %2394 = vmatmul.mubr.msk.f32.gmra.mrb[2].mxu0 %vm115_vm1, %v101_v52 }
  0x57   :  { %2621 = vmatpush3.bf16.msra.mxu1 %v3201_v8  ;;  %2421 = vmatprep.mubr.msk.f32.mxu1 %vm3037_vm0, %v3038_v1 }
  0x58   :  { %2622 = vmatprep.subr.bf16.mxu1 %v3036_v0  ;;  %2630 = vmatpush3.bf16.msra.mxu0 %v3214_v12 }
  0x59   :  { %2637 = vmatprep.subr.bf16.mxu0 %v3036_v0  ;;  %2396 = vmatprep.mubr.msk.f32.mxu0 %vm115_vm1, %v102_v53 }
  0x5a   :  { %2397 = vmatmul.mubr.msk.f32.gmra.mrb[4].mxu0 %vm115_vm1, %v103_v54 }
  0x5b   :  { %2624 = vmatpush3.bf16.msra.mxu1 %v3214_v12  ;;  %2399 = vmatprep.mubr.msk.f32.mxu0 %vm115_vm1, %v104_v55 }
  0x5c   :  { %2631 = vmatprep.subr.bf16.mxu1 %v3036_v0 }
  0x5e   :  { %2400 = vmatmul.mubr.msk.f32.gmra.mrb[6].mxu0 %vm115_vm1, %v105_v56 }
  0x5f   :  { %2432 = vmatprep.mubr.msk.f32.mxu0 %vm3037_vm0, %v3038_v1 }
 0x125   :  { %v2392_v15 = vpop.f32.mrb[0].mxu0 }
 0x126   :  { %v206_v16 = vpop.f32.mrb[1].mxu0  ;;  %v212_v37 = vadd.f32 %v2392_v15, %v3235_v14 }
 0x127   :  { %v207_v17 = vadd.f32 %v3235_v14, %v206_v16 }
 0x129   :  { %v330_v18 = vpop.f32.mrb[0].mxu1  ;;  %v2395_v60 = vpop.f32.mrb[2].mxu0 }
 0x12a   :  { %v334_v19 = vadd.f32 %v330_v18, %v207_v17  ;;  %v2412_v20 = vpop.f32.mrb[1].mxu1  ;;  %v216_v61 = vpop.f32.mrb[3].mxu0 }
 0x12b   :  { %v217_v5 = vadd.f32 %v3235_v14, %v216_v61 }
 0x12c   :  { %2738 = vtanh.f32 %v334_v19  ;;  %v2237_v23 = vmul.f32 -1.442695, %v334_v19 }
 0x12d   :  { %v3282_v62 = vpop.f32.mrb[4].mxu0 }
 0x12e   :  { %2740 = vpow2.f32 %v2237_v23  ;;  %v3284_v63 = vpop.f32.mrb[5].mxu0 }
 0x131   :  { %v3286_v2 = vpop.f32.mrb[6].mxu0 }
 0x132   :  { %v3288_v3 = vpop.f32.mrb[7].mxu0 }
 0x136   :  { %v2739_v21 = vpop.eup %2738 }
 0x137   :  { %348 = vrot.lane.b32.xlu0 %v2739_v21, %s3039_s19 }
 0x138   :  { %v2741_v24 = vpop.eup %2740 }
 0x139   :  { %v338_v25 = vadd.f32 1.0, %v2741_v24 }
 0x13b   :  { %343 = vrot.lane.b32.xlu0 %v258_v22, %s3040_s23  ;;  %2742 = vrcp.f32 %v338_v25 }
 0x145   :  { %v2743_v26 = vpop.eup %2742 }
 0x1a9   :  { %v349_v27 = vpop.permute.xlu0 %348 }
 0x1aa   :  { %v351_v28 = vmul.f32 %v2743_v26, %v349_v27 }
 0x1ac   :  { %353 = vrot.lane.b32.xlu1 %v351_v28, %s3040_s23 }
 0x1ad   :  { %v344_v29 = vpop.permute.xlu0 %343 }
 0x1ae   :  { %v346_v30 = vmul.f32 %v2743_v26, %v344_v29 }
 0x21e   :  { %v354_v31 = vpop.permute.xlu1 %353 }
 0x21f   :  { %v356_v32 = vadd.f32 %v354_v31, %v346_v30 }
 0x221   :  { %2744 = vtanh.f32 %v356_v32 }
 0x22b   :  { %v2745_v33 = vpop.eup %2744 }
 0x22c   :  { %359 = vrot.lane.b32.xlu1 %v2745_v33, %s3039_s19 }
 0x29e   :  { %v360_v34 = vpop.permute.xlu1 %359 }
 0x29f   :  { %v362_v35 = vmul.f32 %v2743_v26, %v360_v34  ;;  %v222_v26 = vadd.f32 %v2395_v60, %v3235_v14 }
 0x2a1   :  { %364 = vrot.lane.b32.xlu0 %v362_v35, %s3040_s23 }
 0x313   :  { %v365_v36 = vpop.permute.xlu0 %364 }
 0x314   :  { %367 = vst.msk [vmem:[#allocation3] sm:$0xff] %vm260_vm2, %v365_v36  ;;  %2422 = vmatmul.mubr.msk.f32.vlgmr.msra.gmra.mrb[2].mxu1 %vm260_vm2, %v365_v36 }
 0x315   :  { %2633 = vmatpush3.bf16.msra.mxu1 %v3201_v8  ;;  %2443 = vmatprep.mubr.msk.f32.mxu1 %vm3037_vm0, %v3038_v1 }
 0x316   :  { %2634 = vmatprep.subr.bf16.mxu1 %v3036_v0 }
 0x319   :  { %2636 = vmatpush3.bf16.msra.mxu1 %v3214_v12 }
 0x31a   :  { %2643 = vmatprep.subr.bf16.mxu1 %v3036_v0 }
 0x3e7   :  { %v438_v38 = vpop.f32.mrb[2].mxu1 }
 0x3e8   :  { %v442_v39 = vadd.f32 %v438_v38, %v212_v37  ;;  %v2423_v40 = vpop.f32.mrb[3].mxu1 }
 0x3ea   :  { %2746 = vtanh.f32 %v442_v39  ;;  %v2239_v42 = vmul.f32 -1.442695, %v442_v39 }
 0x3ec   :  { %2748 = vpow2.f32 %v2239_v42 }
 0x3f4   :  { %v2747_v41 = vpop.eup %2746 }
 0x3f5   :  { %452 = vrot.lane.b32.xlu1 %v2747_v41, %s3039_s19 }
 0x3f6   :  { %v2749_v43 = vpop.eup %2748 }
 0x3f7   :  { %v446_v44 = vadd.f32 1.0, %v2749_v43 }
 0x3f9   :  { %2750 = vrcp.f32 %v446_v44  ;;  %v227_v44 = vadd.f32 %v3235_v14, %v3284_v63  ;;  %v232_v63 = vadd.f32 %v3282_v62, %v3235_v14 }
 0x403   :  { %v2751_v45 = vpop.eup %2750 }
 0x404   :  { %v450_v48 = vmul.f32 %v2751_v45, %v356_v32 }
 0x467   :  { %v453_v46 = vpop.permute.xlu1 %452 }
 0x468   :  { %v455_v47 = vmul.f32 %v2751_v45, %v453_v46 }
 0x46a   :  { %457 = vrot.lane.b32.xlu0 %v455_v47, %s3040_s23 }
 0x4dc   :  { %v458_v49 = vpop.permute.xlu0 %457 }
 0x4dd   :  { %v460_v50 = vadd.f32 %v458_v49, %v450_v48 }
 0x4df   :  { %2752 = vtanh.f32 %v460_v50 }
 0x4e9   :  { %v2753_v57 = vpop.eup %2752 }
 0x4ea   :  { %463 = vrot.lane.b32.xlu1 %v2753_v57, %s3039_s19 }
 0x55c   :  { %v464_v58 = vpop.permute.xlu1 %463 }
 0x55d   :  { %v466_v59 = vmul.f32 %v2751_v45, %v464_v58 }
 0x55f   :  { %468 = vrot.lane.b32.xlu0 %v466_v59, %s3040_s23 }
 0x5d1   :  { %v469_v4 = vpop.permute.xlu0 %468 }
 0x5d2   :  { %472 = vst.msk [vmem:[#allocation3 + $0x8] sm:$0xff] %vm260_vm2, %v469_v4  ;;  %2433 = vmatmul.mubr.msk.f32.vlgmr.msra.gmra.mrb[8].mxu0 %vm260_vm2, %v469_v4 }
 0x5d3   :  { %2639 = vmatpush3.bf16.msra.mxu0 %v3201_v8  ;;  %2454 = vmatprep.mubr.msk.f32.mxu0 %vm3037_vm0, %v3038_v1 }
 0x5d4   :  { %2640 = vmatprep.subr.bf16.mxu0 %v3036_v0 }
 0x5d7   :  { %2642 = vmatpush3.bf16.msra.mxu0 %v3214_v12 }
 0x5d8   :  { %2649 = vmatprep.subr.bf16.mxu0 %v3036_v0 }
 0x6a5   :  { %v543_v6 = vpop.f32.mrb[8].mxu0 }
 0x6a6   :  { %v547_v7 = vadd.f32 %v543_v6, %v217_v5  ;;  %v2434_v9 = vpop.f32.mrb[9].mxu0 }
 0x6a8   :  { %2754 = vtanh.f32 %v547_v7  ;;  %v2241_v11 = vmul.f32 -1.442695, %v547_v7 }
 0x6aa   :  { %2756 = vpow2.f32 %v2241_v11 }
 0x6b2   :  { %v2755_v10 = vpop.eup %2754 }
 0x6b3   :  { %557 = vrot.lane.b32.xlu1 %v2755_v10, %s3039_s19 }
 0x6b4   :  { %v2757_v13 = vpop.eup %2756 }
 0x6b5   :  { %v551_v15 = vadd.f32 1.0, %v2757_v13 }
 0x6b7   :  { %2758 = vrcp.f32 %v551_v15 }
 0x6c1   :  { %v2759_v16 = vpop.eup %2758 }
 0x6c2   :  { %v555_v19 = vmul.f32 %v2759_v16, %v460_v50 }
 0x725   :  { %v558_v17 = vpop.permute.xlu1 %557 }
 0x726   :  { %v560_v18 = vmul.f32 %v2759_v16, %v558_v17  ;;  %v1117_v17 = vld [vmem:[%s3586_s6] sm:$0xff] }
 0x728   :  { %562 = vrot.lane.b32.xlu0 %v560_v18, %s3040_s23  ;;  %v1118_v18 = vld [vmem:[%s3586_s6 + $0x8] sm:$0xff] }
 0x79a   :  { %v563_v20 = vpop.permute.xlu0 %562 }
 0x79b   :  { %v565_v21 = vadd.f32 %v563_v20, %v555_v19  ;;  %v2661_v19 = vpack.c.bf16 %v1118_v18, %v1117_v17 }
 0x79d   :  { %2760 = vtanh.f32 %v565_v21 }
 0x7a7   :  { %v2761_v22 = vpop.eup %2760 }
 0x7a8   :  { %568 = vrot.lane.b32.xlu1 %v2761_v22, %s3039_s19 }
 0x81a   :  { %v569_v23 = vpop.permute.xlu1 %568 }
 0x81b   :  { %v571_v24 = vmul.f32 %v2759_v16, %v569_v23  ;;  %v1119_v23 = vld [vmem:[%s3586_s6 + $0x10] sm:$0xff] }
 0x81d   :  { %573 = vrot.lane.b32.xlu0 %v571_v24, %s3040_s23  ;;  %v1120_v24 = vld [vmem:[%s3586_s6 + $0x18] sm:$0xff] }
 0x88f   :  { %v574_v25 = vpop.permute.xlu0 %573 }
 0x890   :  { %577 = vst.msk [vmem:[#allocation3 + $0x10] sm:$0xff] %vm260_vm2, %v574_v25  ;;  %2444 = vmatmul.mubr.msk.f32.vlgmr.msra.gmra.mrb[4].mxu1 %vm260_vm2, %v574_v25  ;;  %v2665_v25 = vpack.c.bf16 %v1120_v24, %v1119_v23 }
 0x891   :  { %2645 = vmatpush3.bf16.msra.mxu1 %v3201_v8  ;;  %2465 = vmatprep.mubr.msk.f32.mxu1 %vm3037_vm0, %v3038_v1 }
 0x892   :  { %2646 = vmatprep.subr.bf16.mxu1 %v3036_v0 }
 0x895   :  { %2648 = vmatpush3.bf16.msra.mxu1 %v3214_v12 }
 0x896   :  { %2655 = vmatprep.subr.bf16.mxu1 %v3036_v0 }
 0x963   :  { %v648_v27 = vpop.f32.mrb[4].mxu1 }
 0x964   :  { %v652_v28 = vadd.f32 %v648_v27, %v222_v26  ;;  %v2445_v29 = vpop.f32.mrb[5].mxu1  ;;  %v1109_v27 = vld [vmem:[#allocation3] sm:$0xff] }
 0x965   :  { %v1111_v29 = vld [vmem:[#allocation3 + $0x10] sm:$0xff] }
 0x966   :  { %2762 = vtanh.f32 %v652_v28  ;;  %v2243_v31 = vmul.f32 -1.442695, %v652_v28  ;;  %v1110_v28 = vld [vmem:[#allocation3 + $0x8] sm:$0xff] }
 0x968   :  { %2764 = vpow2.f32 %v2243_v31 }
 0x970   :  { %v2763_v30 = vpop.eup %2762 }
 0x971   :  { %662 = vrot.lane.b32.xlu1 %v2763_v30, %s3039_s19 }
 0x972   :  { %v2765_v32 = vpop.eup %2764 }
 0x973   :  { %v656_v33 = vadd.f32 1.0, %v2765_v32 }
 0x975   :  { %2766 = vrcp.f32 %v656_v33  ;;  %v237_v33 = vadd.f32 %v3235_v14, %v3288_v3 }
 0x97f   :  { %v2767_v34 = vpop.eup %2766 }
 0x980   :  { %v660_v37 = vmul.f32 %v2767_v34, %v565_v21 }
 0x9e3   :  { %v663_v35 = vpop.permute.xlu1 %662 }
 0x9e4   :  { %v665_v36 = vmul.f32 %v2767_v34, %v663_v35 }
 0x9e6   :  { %667 = vrot.lane.b32.xlu0 %v665_v36, %s3040_s23 }
 0xa58   :  { %v668_v38 = vpop.permute.xlu0 %667 }
 0xa59   :  { %v670_v39 = vadd.f32 %v668_v38, %v660_v37 }
 0xa5b   :  { %2768 = vtanh.f32 %v670_v39 }
 0xa65   :  { %v2769_v40 = vpop.eup %2768 }
 0xa66   :  { %673 = vrot.lane.b32.xlu1 %v2769_v40, %s3039_s19 }
 0xad8   :  { %v674_v41 = vpop.permute.xlu1 %673 }
 0xad9   :  { %v676_v42 = vmul.f32 %v2767_v34, %v674_v41 }
 0xadb   :  { %678 = vrot.lane.b32.xlu0 %v676_v42, %s3040_s23 }
 0xb4d   :  { %v679_v43 = vpop.permute.xlu0 %678 }
 0xb4e   :  { %682 = vst.msk [vmem:[#allocation3 + $0x18] sm:$0xff] %vm260_vm2, %v679_v43  ;;  %2455 = vmatmul.mubr.msk.f32.vlgmr.msra.gmra.mrb[10].mxu0 %vm260_vm2, %v679_v43 }
 0xb4f   :  { %2651 = vmatpush3.bf16.msra.mxu0 %v3201_v8  ;;  %2476 = vmatprep.mubr.msk.f32.mxu0 %vm3037_vm0, %v3038_v1 }
 0xb50   :  { %2652 = vmatprep.subr.bf16.mxu0 %v3036_v0 }
 0xb53   :  { %2654 = vmatpush3.bf16.msra.mxu0 %v3214_v12 }
 0xb54   :  { %2662 = vmatprep.subr.bf16.mxu0 %v2661_v19 }
 0xb55   :  { %v1112_v30 = vld [vmem:[#allocation3 + $0x18] sm:$0xff] }
 0xc21   :  { %v753_v45 = vpop.f32.mrb[10].mxu0 }
 0xc22   :  { %v757_v46 = vadd.f32 %v753_v45, %v227_v44  ;;  %v2456_v47 = vpop.f32.mrb[11].mxu0 }
 0xc24   :  { %2770 = vtanh.f32 %v757_v46  ;;  %v2245_v49 = vmul.f32 -1.442695, %v757_v46 }
 0xc26   :  { %2772 = vpow2.f32 %v2245_v49 }
 0xc2e   :  { %v2771_v48 = vpop.eup %2770 }
 0xc2f   :  { %767 = vrot.lane.b32.xlu1 %v2771_v48, %s3039_s19 }
 0xc30   :  { %v2773_v50 = vpop.eup %2772 }
 0xc31   :  { %v761_v51 = vadd.f32 1.0, %v2773_v50 }
 0xc33   :  { %2774 = vrcp.f32 %v761_v51 }
 0xc3d   :  { %v2775_v52 = vpop.eup %2774 }
 0xc3e   :  { %v765_v55 = vmul.f32 %v2775_v52, %v670_v39 }
 0xca1   :  { %v768_v53 = vpop.permute.xlu1 %767 }
 0xca2   :  { %v770_v54 = vmul.f32 %v2775_v52, %v768_v53  ;;  %v1265_v53 = vld [vmem:[%s3587_s7] sm:$0xff] }
 0xca4   :  { %772 = vrot.lane.b32.xlu0 %v770_v54, %s3040_s23  ;;  %v1266_v54 = vld [vmem:[%s3587_s7 + $0x8] sm:$0xff] }
 0xd16   :  { %v773_v56 = vpop.permute.xlu0 %772 }
 0xd17   :  { %v775_v57 = vadd.f32 %v773_v56, %v765_v55  ;;  %v3388_v55 = vpack.c.bf16 %v1266_v54, %v1265_v53  ;;  %v1267_v56 = vld [vmem:[%s3587_s7 + $0x10] sm:$0xff] }
 0xd19   :  { %2776 = vtanh.f32 %v775_v57 }
 0xd23   :  { %v2777_v58 = vpop.eup %2776 }
 0xd24   :  { %778 = vrot.lane.b32.xlu1 %v2777_v58, %s3039_s19 }
 0xd96   :  { %v779_v59 = vpop.permute.xlu1 %778 }
 0xd97   :  { %v781_v60 = vmul.f32 %v2775_v52, %v779_v59 }
 0xd99   :  { %783 = vrot.lane.b32.xlu0 %v781_v60, %s3040_s23 }
 0xe0b   :  { %v784_v61 = vpop.permute.xlu0 %783 }
 0xe0c   :  { %787 = vst.msk [vmem:[#allocation3 + $0x20] sm:$0xff] %vm260_vm2, %v784_v61  ;;  %2466 = vmatmul.mubr.msk.f32.vlgmr.msra.gmra.mrb[6].mxu1 %vm260_vm2, %v784_v61  ;;  %v1272_v61 = vld [vmem:[#allocation7 + $0x8] sm:$0xff] }
 0xe0d   :  { %2657 = vmatpush3.bf16.msra.mxu1 %v3201_v8  ;;  %2487 = vmatprep.mubr.msk.f32.mxu1 %vm3037_vm0, %v3038_v1 }
 0xe0e   :  { %2658 = vmatprep.subr.bf16.mxu1 %v3036_v0 }
 0xe11   :  { %2660 = vmatpush3.bf16.msra.mxu1 %v3214_v12 }
 0xe12   :  { %2669 = vmatprep.subr.bf16.mxu1 %v3036_v0 }
 0xe13   :  { %v1113_v31 = vld [vmem:[#allocation3 + $0x20] sm:$0xff] }
 0xedf   :  { %v858_v4 = vpop.f32.mrb[6].mxu1 }
 0xee0   :  { %v862_v5 = vadd.f32 %v858_v4, %v232_v63  ;;  %v2467_v6 = vpop.f32.mrb[7].mxu1  ;;  %v1270_v4 = vld [vmem:[#allocation4 + $0x8] sm:$0xff] }
 0xee1   :  { %v242_v6 = vadd.f32 %v3286_v2, %v3235_v14 }
 0xee2   :  { %2778 = vtanh.f32 %v862_v5  ;;  %v2247_v8 = vmul.f32 -1.442695, %v862_v5 }
 0xee4   :  { %2780 = vpow2.f32 %v2247_v8 }
 0xeec   :  { %v2779_v7 = vpop.eup %2778 }
 0xeed   :  { %872 = vrot.lane.b32.xlu1 %v2779_v7, %s3039_s19 }
 0xeee   :  { %v2781_v9 = vpop.eup %2780 }
 0xeef   :  { %v866_v10 = vadd.f32 1.0, %v2781_v9 }
 0xef1   :  { %2782 = vrcp.f32 %v866_v10  ;;  %v3425_v10 = vld [vmem:[%s3588_s8] ss:$0 sm:$0xff]  ;;  %s3041_s8 = smov 96  }
 0xefb   :  { %v2783_v11 = vpop.eup %2782 }
 0xefc   :  { %v870_v15 = vmul.f32 %v2783_v11, %v775_v57  ;;  %v1268_v57 = vld [vmem:[%s3587_s7 + $0x18] sm:$0xff] }
 0xefd   :  { %v3398_v58 = vpack.c.bf16 %v1268_v57, %v1267_v56 }
 0xf5f   :  { %v873_v13 = vpop.permute.xlu1 %872 }
 0xf60   :  { %v875_v12 = vmul.f32 %v2783_v11, %v873_v13 }
 0xf62   :  { %877 = vrot.lane.b32.xlu0 %v875_v12, %s3040_s23 }
 0xfd4   :  { %v878_v16 = vpop.permute.xlu0 %877 }
 0xfd5   :  { %v880_v62 = vadd.f32 %v878_v16, %v870_v15 }
 0xfd7   :  { %2784 = vtanh.f32 %v880_v62 }
 0xfe1   :  { %v2785_v20 = vpop.eup %2784 }
 0xfe2   :  { %883 = vrot.lane.b32.xlu1 %v2785_v20, %s3039_s19 }
0x1054   :  { %v884_v21 = vpop.permute.xlu1 %883 }
0x1055   :  { %v886_v22 = vmul.f32 %v2783_v11, %v884_v21 }
0x1057   :  { %888 = vrot.lane.b32.xlu0 %v886_v22, %s3040_s23 }
0x10c9   :  { %v889_v26 = vpop.permute.xlu0 %888 }
0x10ca   :  { %892 = vst.msk [vmem:[#allocation3 + $0x28] sm:$0xff] %vm260_vm2, %v889_v26  ;;  %2477 = vmatmul.mubr.msk.f32.vlgmr.msra.gmra.mrb[12].mxu0 %vm260_vm2, %v889_v26 }
0x10cb   :  { %2664 = vmatpush3.bf16.msra.mxu0 %v2661_v19  ;;  %2498 = vmatprep.mubr.msk.f32.mxu0 %vm260_vm2, %v1109_v27 }
0x10cc   :  { %2666 = vmatprep.subr.bf16.mxu0 %v2665_v25 }
0x10cf   :  { %2668 = vmatpush3.bf16.msra.mxu0 %v2665_v25 }
0x10d0   :  { %2681 = vmatprep.subr.bf16.mxu0 %v3036_v0 }
0x10d1   :  { %v1114_v32 = vld [vmem:[#allocation3 + $0x28] sm:$0xff] }
0x10d2   :  { %2499 = vmatmul.mubr.msk.f32.vlgmr.msra.gmra.mrb[14].mxu0 %vm260_vm2, %v1110_v28 }
0x10d3   :  { %2501 = vmatprep.mubr.msk.f32.mxu0 %vm260_vm2, %v1111_v29  ;;  %2683 = vmatpush3.bf16.msra.mxu0 %v3388_v55 }
0x10d4   :  { %2684 = vmatprep.subr.bf16.mxu0 %v3036_v0 }
0x10d6   :  { %2502 = vmatmul.mubr.msk.f32.gmra.mrb[16].mxu0 %vm260_vm2, %v1112_v30 }
0x10d7   :  { %2504 = vmatprep.mubr.msk.f32.mxu0 %vm260_vm2, %v1113_v31  ;;  %2686 = vmatpush3.bf16.msra.mxu0 %v3398_v58 }
0x10d8   :  { %2693 = vmatprep.subr.bf16.mxu0 %v3036_v0 }
0x10da   :  { %2505 = vmatmul.mubr.msk.f32.gmra.mrb[18].mxu0 %vm260_vm2, %v1114_v32 }
0x119d   :  { %v963_v34 = vpop.f32.mrb[12].mxu0 }
0x119e   :  { %v967_v35 = vadd.f32 %v963_v34, %v237_v33  ;;  %v2478_v36 = vpop.f32.mrb[13].mxu0 }
0x11a0   :  { %2786 = vtanh.f32 %v967_v35  ;;  %v2249_v44 = vmul.f32 -1.442695, %v967_v35 }
0x11a2   :  { %2788 = vpow2.f32 %v2249_v44 }
0x11a5   :  { %v3366_v37 = vpop.f32.mrb[14].mxu0 }
0x11a6   :  { %v1218_v38 = vpop.f32.mrb[15].mxu0 }
0x11a7   :  { %v1219_v11 = vadd.f32 %v3425_v10, %v1218_v38 }
0x11a9   :  { %v3368_v39 = vpop.f32.mrb[16].mxu0 }
0x11aa   :  { %v2787_v40 = vpop.eup %2786  ;;  %v3370_v41 = vpop.f32.mrb[17].mxu0 }
0x11ab   :  { %977 = vrot.lane.b32.xlu1 %v2787_v40, %s3039_s19 }
0x11ac   :  { %v2789_v3 = vpop.eup %2788 }
0x11ad   :  { %v3373_v42 = vpop.f32.mrb[18].mxu0  ;;  %v971_v45 = vadd.f32 1.0, %v2789_v3 }
0x11ae   :  { %v3375_v43 = vpop.f32.mrb[19].mxu0 }
0x11af   :  { %2790 = vrcp.f32 %v971_v45  ;;  %v1224_v45 = vadd.f32 %v3366_v37, %v3425_v10 }
0x11b9   :  { %v2791_v46 = vpop.eup %2790 }
0x11ba   :  { %v975_v49 = vmul.f32 %v2791_v46, %v880_v62 }
0x121d   :  { %v978_v47 = vpop.permute.xlu1 %977 }
0x121e   :  { %v980_v48 = vmul.f32 %v2791_v46, %v978_v47 }
0x1220   :  { %982 = vrot.lane.b32.xlu0 %v980_v48, %s3040_s23 }
0x1292   :  { %v983_v50 = vpop.permute.xlu0 %982 }
0x1293   :  { %v3378_v51 = vadd.f32 %v983_v50, %v975_v49 }
0x1295   :  { %2792 = vtanh.f32 %v3378_v51 }
0x129f   :  { %v2793_v52 = vpop.eup %2792 }
0x12a0   :  { %988 = vrot.lane.b32.xlu1 %v2793_v52, %s3039_s19 }
0x1312   :  { %v989_v59 = vpop.permute.xlu1 %988 }
0x1313   :  { %v991_v60 = vmul.f32 %v2791_v46, %v989_v59 }
0x1315   :  { %993 = vrot.lane.b32.xlu0 %v991_v60, %s3040_s23 }
0x1319   :  { %1356 = vrot.lane.b32.xlu0 %v1272_v61, %s3040_s23 }
0x1387   :  { %v994_v63 = vpop.permute.xlu0 %993 }
0x1388   :  { %997 = vst.msk [vmem:[#allocation3 + $0x30] sm:$0xff] %vm260_vm2, %v994_v63  ;;  %2488 = vmatmul.mubr.msk.f32.vlgmr.msra.gmra.mrb[8].mxu1 %vm260_vm2, %v994_v63 }
0x1389   :  { %2671 = vmatpush3.bf16.msra.mxu1 %v3388_v55  ;;  %2518 = vmatprep.mubr.msk.f32.mxu1 %vm3037_vm0, %v3038_v1 }
0x138a   :  { %2672 = vmatprep.subr.bf16.mxu1 %v3036_v0 }
0x138b   :  { %v1357_v20 = vpop.permute.xlu0 %1356 }
0x138d   :  { %2674 = vmatpush3.bf16.msra.mxu1 %v3398_v58 }
0x138e   :  { %2675 = vmatprep.subr.bf16.mxu1 %v3036_v0 }
0x138f   :  { %v1115_v5 = vld [vmem:[#allocation3 + $0x30] sm:$0xff] }
0x1390   :  { %2519 = vmatmul.mubr.msk.f32.vlgmr.msra.gmra.mrb[10].mxu1 %vm260_vm2, %v1270_v4  ;;  %2507 = vmatprep.mubr.msk.f32.mxu0 %vm260_vm2, %v1115_v5 }
0x1391   :  { %2677 = vmatpush3.bf16.msra.mxu1 %v3388_v55  ;;  %2529 = vmatprep.mubr.msk.f32.mxu1 %vm3037_vm0, %v3038_v1 }
0x1392   :  { %2678 = vmatprep.subr.bf16.mxu1 %v3036_v0 }
0x1395   :  { %2680 = vmatpush3.bf16.msra.mxu1 %v3398_v58 }
0x1396   :  { %2687 = vmatprep.subr.bf16.mxu1 %v3036_v0 }
0x145b   :  { %v1068_v7 = vpop.f32.mrb[8].mxu1 }
0x145c   :  { %v1072_v8 = vadd.f32 %v1068_v7, %v242_v6  ;;  %v2489_v9 = vpop.f32.mrb[9].mxu1 }
0x145d   :  { %v1229_v9 = vadd.f32 %v3425_v10, %v3370_v41 }
0x145e   :  { %v2251_v26 = vmul.f32 -1.442695, %v1072_v8 }
0x1463   :  { %v1343_v13 = vpop.f32.mrb[10].mxu1 }
0x1464   :  { %v1347_v12 = vadd.f32 %v1343_v13, %v1219_v11  ;;  %v2520_v15 = vpop.f32.mrb[11].mxu1 }
0x1466   :  { %2794 = vtanh.f32 %v1347_v12  ;;  %v2262_v62 = vmul.f32 -1.442695, %v1347_v12 }
0x1468   :  { %2796 = vpow2.f32 %v2262_v62 }
0x1470   :  { %v2795_v16 = vpop.eup %2794 }
0x1471   :  { %1361 = vrot.lane.b32.xlu1 %v2795_v16, %s3039_s19 }
0x1472   :  { %v2797_v14 = vpop.eup %2796 }
0x1473   :  { %v1351_v2 = vadd.f32 1.0, %v2797_v14 }
0x1475   :  { %2798 = vrcp.f32 %v1351_v2 }
0x147f   :  { %v2799_v17 = vpop.eup %2798 }
0x1480   :  { %v1359_v21 = vmul.f32 %v2799_v17, %v1357_v20 }
0x14e3   :  { %v1362_v18 = vpop.permute.xlu1 %1361 }
0x14e4   :  { %v1364_v19 = vmul.f32 %v2799_v17, %v1362_v18 }
0x14e6   :  { %1366 = vrot.lane.b32.xlu1 %v1364_v19, %s3040_s23 }
0x1558   :  { %v1367_v22 = vpop.permute.xlu1 %1366 }
0x1559   :  { %v1369_v23 = vadd.f32 %v1367_v22, %v1359_v21 }
0x155b   :  { %2800 = vtanh.f32 %v1369_v23 }
0x155c   :  { %2802 = vtanh.f32 %v1072_v8 }
0x155d   :  { %2804 = vpow2.f32 %v2251_v26 }
0x1565   :  { %v2801_v24 = vpop.eup %2800 }
0x1566   :  { %1372 = vrot.lane.b32.xlu0 %v2801_v24, %s3039_s19  ;;  %v2803_v25 = vpop.eup %2802 }
0x1567   :  { %v2805_v27 = vpop.eup %2804 }
0x1568   :  { %v1076_v28 = vadd.f32 1.0, %v2805_v27 }
0x156a   :  { %1082 = vrot.lane.b32.xlu0 %v2803_v25, %s3039_s19  ;;  %2806 = vrcp.f32 %v1076_v28  ;;  %v1234_v25 = vadd.f32 %v3368_v39, %v3425_v10 }
0x1574   :  { %v2807_v31 = vpop.eup %2806 }
0x1575   :  { %v1080_v35 = vmul.f32 %v2807_v31, %v3378_v51 }
0x15d8   :  { %v1373_v29 = vpop.permute.xlu0 %1372 }
0x15d9   :  { %v1375_v30 = vmul.f32 %v2799_v17, %v1373_v29 }
0x15db   :  { %1378 = vrot.lane.b32.xlu1 %v1375_v30, %s3040_s23 }
0x15dc   :  { %v1083_v32 = vpop.permute.xlu0 %1082 }
0x15dd   :  { %v1085_v33 = vmul.f32 %v2807_v31, %v1083_v32 }
0x15df   :  { %1087 = vrot.lane.b32.xlu0 %v1085_v33, %s3040_s23 }
0x164d   :  { %v1379_v34 = vpop.permute.xlu1 %1378 }
0x164e   :  { %2530 = vmatmul.mubr.msk.f32.vlgmr.msra.gmra.mrb[12].mxu1 %vm260_vm2, %v1379_v34 }
0x164f   :  { %2689 = vmatpush3.bf16.msra.mxu1 %v3388_v55  ;;  %2551 = vmatprep.mubr.msk.f32.mxu1 %vm3037_vm0, %v3038_v1 }
0x1650   :  { %2690 = vmatprep.subr.bf16.mxu1 %v3036_v0 }
0x1651   :  { %v1088_v36 = vpop.permute.xlu0 %1087 }
0x1652   :  { %v3440_v38 = vadd.f32 %v1088_v36, %v1080_v35 }
0x1653   :  { %2692 = vmatpush3.bf16.msra.mxu1 %v3398_v58 }
0x1654   :  { %2808 = vtanh.f32 %v3440_v38  ;;  %2699 = vmatprep.subr.bf16.mxu1 %v3036_v0 }
0x165e   :  { %v2809_v40 = vpop.eup %2808 }
0x165f   :  { %1093 = vrot.lane.b32.xlu0 %v2809_v40, %s3039_s19 }
0x16d1   :  { %v1094_v44 = vpop.permute.xlu0 %1093 }
0x16d2   :  { %v1096_v3 = vmul.f32 %v2807_v31, %v1094_v44 }
0x16d4   :  { %1098 = vrot.lane.b32.xlu0 %v1096_v3, %s3040_s23 }
0x1721   :  { %v1448_v46 = vpop.f32.mrb[12].mxu1 }
0x1722   :  { %v1452_v47 = vadd.f32 %v1448_v46, %v1224_v45  ;;  %v2531_v48 = vpop.f32.mrb[13].mxu1 }
0x1724   :  { %2810 = vtanh.f32 %v1452_v47  ;;  %v2264_v52 = vmul.f32 -1.442695, %v1452_v47  ;;  %v1239_v47 = vadd.f32 %v3425_v10, %v3375_v43 }
0x1726   :  { %2812 = vpow2.f32 %v2264_v52 }
0x172e   :  { %v2811_v49 = vpop.eup %2810 }
0x172f   :  { %1462 = vrot.lane.b32.xlu1 %v2811_v49, %s3039_s19 }
0x1730   :  { %v2813_v37 = vpop.eup %2812 }
0x1731   :  { %v1456_v53 = vadd.f32 1.0, %v2813_v37 }
0x1733   :  { %2814 = vrcp.f32 %v1456_v53 }
0x173d   :  { %v2815_v54 = vpop.eup %2814 }
0x173e   :  { %v1460_v59 = vmul.f32 %v2815_v54, %v1369_v23 }
0x1746   :  { %v1099_v50 = vpop.permute.xlu0 %1098 }
0x1747   :  { %1102 = vst.msk [vmem:[#allocation3 + $0x38] sm:$0xff] %vm260_vm2, %v1099_v50  ;;  %1103 = vst.msk [vmem:[#allocation13] sm:$0xff] %vm260_vm2, %v1099_v50 }
0x174e   :  { %v1116_v51 = vld [vmem:[#allocation3 + $0x38] sm:$0xff] }
0x174f   :  { %2508 = vmatmul.mubr.msk.f32.gmra.mrb[20].mxu0 %vm260_vm2, %v1116_v51 }
0x1750   :  { %2540 = vmatprep.mubr.msk.f32.mxu0 %vm3037_vm0, %v3038_v1 }
0x17a1   :  { %v1463_v56 = vpop.permute.xlu1 %1462 }
0x17a2   :  { %v1465_v57 = vmul.f32 %v2815_v54, %v1463_v56 }
0x17a4   :  { %1467 = vrot.lane.b32.xlu1 %v1465_v57, %s3040_s23 }
0x1816   :  { %v1468_v60 = vpop.permute.xlu1 %1467 }
0x1817   :  { %v1470_v61 = vadd.f32 %v1468_v60, %v1460_v59 }
0x1819   :  { %2816 = vtanh.f32 %v1470_v61 }
0x1822   :  { %v3456_v63 = vpop.f32.mrb[20].mxu0 }
0x1823   :  { %v2817_v4 = vpop.eup %2816  ;;  %v3458_v5 = vpop.f32.mrb[21].mxu0 }
0x1824   :  { %1473 = vrot.lane.b32.xlu1 %v2817_v4, %s3039_s19 }
0x1896   :  { %v1474_v6 = vpop.permute.xlu1 %1473 }
0x1897   :  { %v1476_v7 = vmul.f32 %v2815_v54, %v1474_v6 }
0x1899   :  { %1479 = vrot.lane.b32.xlu1 %v1476_v7, %s3040_s23 }
0x190b   :  { %v1480_v8 = vpop.permute.xlu1 %1479 }
0x190c   :  { %2541 = vmatmul.mubr.msk.f32.vlgmr.msra.gmra.mrb[22].mxu0 %vm260_vm2, %v1480_v8  ;;  %v1244_v8 = vadd.f32 %v3373_v42, %v3425_v10 }
0x190d   :  { %2695 = vmatpush3.bf16.msra.mxu0 %v3388_v55  ;;  %2562 = vmatprep.mubr.msk.f32.mxu0 %vm3037_vm0, %v3038_v1 }
0x190e   :  { %2696 = vmatprep.subr.bf16.mxu0 %v3036_v0 }
0x1911   :  { %2698 = vmatpush3.bf16.msra.mxu0 %v3398_v58 }
0x1912   :  { %2705 = vmatprep.subr.bf16.mxu0 %v3036_v0 }
0x19df   :  { %v1549_v11 = vpop.f32.mrb[22].mxu0 }
0x19e0   :  { %v1553_v13 = vadd.f32 %v1549_v11, %v1229_v9  ;;  %v2542_v12 = vpop.f32.mrb[23].mxu0 }
0x19e2   :  { %2818 = vtanh.f32 %v1553_v13  ;;  %v2266_v16 = vmul.f32 -1.442695, %v1553_v13 }
0x19e4   :  { %2820 = vpow2.f32 %v2266_v16 }
0x19ec   :  { %v2819_v15 = vpop.eup %2818 }
0x19ed   :  { %1563 = vrot.lane.b32.xlu0 %v2819_v15, %s3039_s19 }
0x19ee   :  { %v2821_v62 = vpop.eup %2820 }
0x19ef   :  { %v1557_v14 = vadd.f32 1.0, %v2821_v62 }
0x19f1   :  { %2822 = vrcp.f32 %v1557_v14 }
0x19fb   :  { %v2823_v2 = vpop.eup %2822 }
0x19fc   :  { %v1561_v19 = vmul.f32 %v2823_v2, %v1470_v61 }
0x1a5f   :  { %v1564_v17 = vpop.permute.xlu0 %1563 }
0x1a60   :  { %v1566_v18 = vmul.f32 %v2823_v2, %v1564_v17 }
0x1a62   :  { %1568 = vrot.lane.b32.xlu1 %v1566_v18, %s3040_s23 }
0x1ad4   :  { %v1569_v20 = vpop.permute.xlu1 %1568 }
0x1ad5   :  { %v1571_v41 = vadd.f32 %v1569_v20, %v1561_v19 }
0x1ad7   :  { %2824 = vtanh.f32 %v1571_v41 }
0x1ae1   :  { %v2825_v21 = vpop.eup %2824 }
0x1ae2   :  { %1574 = vrot.lane.b32.xlu0 %v2825_v21, %s3039_s19  ;;  %v1249_v21 = vadd.f32 %v3425_v10, %v3458_v5 }
0x1b54   :  { %v1575_v22 = vpop.permute.xlu0 %1574 }
0x1b55   :  { %v1577_v23 = vmul.f32 %v2823_v2, %v1575_v22 }
0x1b57   :  { %1580 = vrot.lane.b32.xlu1 %v1577_v23, %s3040_s23 }
0x1bc9   :  { %v1581_v24 = vpop.permute.xlu1 %1580 }
0x1bca   :  { %2552 = vmatmul.mubr.msk.f32.vlgmr.msra.gmra.mrb[14].mxu1 %vm260_vm2, %v1581_v24 }
0x1bcb   :  { %2701 = vmatpush3.bf16.msra.mxu1 %v3388_v55  ;;  %2573 = vmatprep.mubr.msk.f32.mxu1 %vm3037_vm0, %v3038_v1 }
0x1bcc   :  { %2702 = vmatprep.subr.bf16.mxu1 %v3036_v0 }
0x1bcf   :  { %2704 = vmatpush3.bf16.msra.mxu1 %v3398_v58 }
0x1bd0   :  { %2711 = vmatprep.subr.bf16.mxu1 %v3036_v0 }
0x1c9d   :  { %v1650_v26 = vpop.f32.mrb[14].mxu1 }
0x1c9e   :  { %v1654_v27 = vadd.f32 %v1650_v26, %v1234_v25  ;;  %v2553_v28 = vpop.f32.mrb[15].mxu1 }
0x1ca0   :  { %2826 = vtanh.f32 %v1654_v27  ;;  %v2268_v30 = vmul.f32 -1.442695, %v1654_v27 }
0x1ca2   :  { %2828 = vpow2.f32 %v2268_v30 }
0x1caa   :  { %v2827_v29 = vpop.eup %2826 }
0x1cab   :  { %1664 = vrot.lane.b32.xlu0 %v2827_v29, %s3039_s19 }
0x1cac   :  { %v2829_v31 = vpop.eup %2828 }
0x1cad   :  { %v1658_v32 = vadd.f32 1.0, %v2829_v31 }
0x1caf   :  { %2830 = vrcp.f32 %v1658_v32 }
0x1cb9   :  { %v2831_v33 = vpop.eup %2830 }
0x1cba   :  { %v1662_v36 = vmul.f32 %v2831_v33, %v1571_v41 }
0x1d1d   :  { %v1665_v34 = vpop.permute.xlu0 %1664 }
0x1d1e   :  { %v1667_v35 = vmul.f32 %v2831_v33, %v1665_v34 }
0x1d20   :  { %1669 = vrot.lane.b32.xlu1 %v1667_v35, %s3040_s23 }
0x1d92   :  { %v1670_v40 = vpop.permute.xlu1 %1669 }
0x1d93   :  { %v1672_v39 = vadd.f32 %v1670_v40, %v1662_v36  ;;  %v1254_v40 = vadd.f32 %v3456_v63, %v3425_v10  ;;  %v2095_v63 = vld [vmem:[#allocation10] sm:$0xff] }
0x1d95   :  { %2832 = vtanh.f32 %v1672_v39 }
0x1d9f   :  { %v2833_v44 = vpop.eup %2832 }
0x1da0   :  { %1675 = vrot.lane.b32.xlu0 %v2833_v44, %s3039_s19 }
0x1e12   :  { %v1676_v3 = vpop.permute.xlu0 %1675 }
0x1e13   :  { %v1678_v45 = vmul.f32 %v2831_v33, %v1676_v3 }
0x1e15   :  { %1681 = vrot.lane.b32.xlu1 %v1678_v45, %s3040_s23 }
0x1e87   :  { %v1682_v46 = vpop.permute.xlu1 %1681 }
0x1e88   :  { %2563 = vmatmul.mubr.msk.f32.vlgmr.msra.gmra.mrb[24].mxu0 %vm260_vm2, %v1682_v46 }
0x1e89   :  { %2707 = vmatpush3.bf16.msra.mxu0 %v3388_v55  ;;  %2584 = vmatprep.mubr.msk.f32.mxu0 %vm3037_vm0, %v3038_v1 }
0x1e8a   :  { %2708 = vmatprep.subr.bf16.mxu0 %v3036_v0 }
0x1e8d   :  { %2710 = vmatpush3.bf16.msra.mxu0 %v3398_v58 }
0x1e8e   :  { %2717 = vmatprep.subr.bf16.mxu0 %v3036_v0 }
0x1f5b   :  { %v1751_v48 = vpop.f32.mrb[24].mxu0 }
0x1f5c   :  { %v1755_v49 = vadd.f32 %v1751_v48, %v1239_v47  ;;  %v2564_v50 = vpop.f32.mrb[25].mxu0 }
0x1f5e   :  { %2834 = vtanh.f32 %v1755_v49  ;;  %v2270_v52 = vmul.f32 -1.442695, %v1755_v49 }
0x1f60   :  { %2836 = vpow2.f32 %v2270_v52 }
0x1f68   :  { %v2835_v51 = vpop.eup %2834 }
0x1f69   :  { %1765 = vrot.lane.b32.xlu0 %v2835_v51, %s3039_s19 }
0x1f6a   :  { %v2837_v37 = vpop.eup %2836 }
0x1f6b   :  { %v1759_v53 = vadd.f32 1.0, %v2837_v37 }
0x1f6d   :  { %2838 = vrcp.f32 %v1759_v53  ;;  %v2096_v53 = vld [vmem:[#allocation10 + $0x8] sm:$0xff] }
0x1f77   :  { %v2839_v54 = vpop.eup %2838 }
0x1f78   :  { %v1763_v59 = vmul.f32 %v2839_v54, %v1672_v39 }
0x1fdb   :  { %v1766_v56 = vpop.permute.xlu0 %1765 }
0x1fdc   :  { %v1768_v57 = vmul.f32 %v2839_v54, %v1766_v56  ;;  %v2718_v56 = vpack.c.bf16 %v2096_v53, %v2095_v63 }
0x1fde   :  { %1770 = vrot.lane.b32.xlu1 %v1768_v57, %s3040_s23  ;;  %v2098_v57 = vld [vmem:[#allocation10 + $0x18] sm:$0xff] }
0x2050   :  { %v1771_v60 = vpop.permute.xlu1 %1770 }
0x2051   :  { %v1773_v43 = vadd.f32 %v1771_v60, %v1763_v59 }
0x2053   :  { %2840 = vtanh.f32 %v1773_v43 }
0x205d   :  { %v2841_v61 = vpop.eup %2840 }
0x205e   :  { %1776 = vrot.lane.b32.xlu0 %v2841_v61, %s3039_s19 }
0x20d0   :  { %v1777_v4 = vpop.permute.xlu0 %1776 }
0x20d1   :  { %v1779_v6 = vmul.f32 %v2839_v54, %v1777_v4  ;;  %v2097_v54 = vld [vmem:[#allocation10 + $0x10] sm:$0xff] }
0x20d2   :  { %v2721_v59 = vpack.c.bf16 %v2098_v57, %v2097_v54 }
0x20d3   :  { %1782 = vrot.lane.b32.xlu1 %v1779_v6, %s3040_s23 }
0x2145   :  { %v1783_v7 = vpop.permute.xlu1 %1782 }
0x2146   :  { %2574 = vmatmul.mubr.msk.f32.vlgmr.msra.gmra.mrb[16].mxu1 %vm260_vm2, %v1783_v7 }
0x2147   :  { %2713 = vmatpush3.bf16.msra.mxu1 %v3388_v55  ;;  %2595 = vmatprep.mubr.msk.f32.mxu1 %vm3037_vm0, %v3038_v1 }
0x2148   :  { %2714 = vmatprep.subr.bf16.mxu1 %v3036_v0 }
0x214b   :  { %2716 = vmatpush3.bf16.msra.mxu1 %v3398_v58 }
0x2219   :  { %v1852_v9 = vpop.f32.mrb[16].mxu1 }
0x221a   :  { %v1856_v11 = vadd.f32 %v1852_v9, %v1244_v8  ;;  %v2575_v13 = vpop.f32.mrb[17].mxu1 }
0x221c   :  { %2842 = vtanh.f32 %v1856_v11  ;;  %v2272_v15 = vmul.f32 -1.442695, %v1856_v11 }
0x221e   :  { %2844 = vpow2.f32 %v2272_v15 }
0x2226   :  { %v2843_v12 = vpop.eup %2842 }
0x2227   :  { %1866 = vrot.lane.b32.xlu0 %v2843_v12, %s3039_s19 }
0x2228   :  { %v2845_v55 = vpop.eup %2844 }
0x2229   :  { %v1860_v16 = vadd.f32 1.0, %v2845_v55 }
0x222b   :  { %2846 = vrcp.f32 %v1860_v16 }
0x2235   :  { %v2847_v62 = vpop.eup %2846 }
0x2236   :  { %v1864_v58 = vmul.f32 %v2847_v62, %v1773_v43 }
0x2299   :  { %v1867_v14 = vpop.permute.xlu0 %1866 }
0x229a   :  { %v1869_v2 = vmul.f32 %v2847_v62, %v1867_v14 }
0x229c   :  { %1871 = vrot.lane.b32.xlu1 %v1869_v2, %s3040_s23 }
0x230e   :  { %v1872_v17 = vpop.permute.xlu1 %1871 }
0x230f   :  { %v1874_v42 = vadd.f32 %v1872_v17, %v1864_v58 }
0x2311   :  { %2848 = vtanh.f32 %v1874_v42 }
0x231b   :  { %v2849_v18 = vpop.eup %2848 }
0x231c   :  { %1877 = vrot.lane.b32.xlu0 %v2849_v18, %s3039_s19 }
0x238e   :  { %v1878_v19 = vpop.permute.xlu0 %1877 }
0x238f   :  { %v1880_v20 = vmul.f32 %v2847_v62, %v1878_v19 }
0x2391   :  { %1883 = vrot.lane.b32.xlu1 %v1880_v20, %s3040_s23 }
0x2403   :  { %v1884_v41 = vpop.permute.xlu1 %1883 }
0x2404   :  { %2585 = vmatmul.mubr.msk.f32.vlgmr.msra.gmra.mrb[26].mxu0 %vm260_vm2, %v1884_v41 }
0x2405   :  { %2606 = vmatprep.mubr.msk.f32.mxu0 %vm3037_vm0, %v3038_v1  ;;  %2719 = vmatpush3.bf16.msra.mxu0 %v2718_v56 }
0x2406   :  { %2720 = vmatprep.subr.bf16.mxu0 %v3036_v0 }
0x2409   :  { %2722 = vmatpush3.bf16.msra.mxu0 %v2721_v59 }
0x24d7   :  { %v1953_v22 = vpop.f32.mrb[26].mxu0 }
0x24d8   :  { %v1957_v23 = vadd.f32 %v1953_v22, %v1249_v21  ;;  %v2586_v24 = vpop.f32.mrb[27].mxu0 }
0x24da   :  { %2850 = vtanh.f32 %v1957_v23  ;;  %v2274_v26 = vmul.f32 -1.442695, %v1957_v23 }
0x24dc   :  { %2852 = vpow2.f32 %v2274_v26 }
0x24e4   :  { %v2851_v25 = vpop.eup %2850 }
0x24e5   :  { %1967 = vrot.lane.b32.xlu0 %v2851_v25, %s3039_s19 }
0x24e6   :  { %v2853_v27 = vpop.eup %2852 }
0x24e7   :  { %v1961_v28 = vadd.f32 1.0, %v2853_v27 }
0x24e9   :  { %2854 = vrcp.f32 %v1961_v28 }
0x24f3   :  { %v2855_v29 = vpop.eup %2854 }
0x24f4   :  { %v1965_v1 = vmul.f32 %v2855_v29, %v1874_v42 }
0x2557   :  { %v1968_v30 = vpop.permute.xlu0 %1967 }
0x2558   :  { %v1970_v31 = vmul.f32 %v2855_v29, %v1968_v30 }
0x255a   :  { %1972 = vrot.lane.b32.xlu1 %v1970_v31, %s3040_s23 }
0x25cc   :  { %v1973_v32 = vpop.permute.xlu1 %1972 }
0x25cd   :  { %v1975_v5 = vadd.f32 %v1973_v32, %v1965_v1 }
0x25cf   :  { %2856 = vtanh.f32 %v1975_v5 }
0x25d9   :  { %v2857_v33 = vpop.eup %2856 }
0x25da   :  { %1978 = vrot.lane.b32.xlu0 %v2857_v33, %s3039_s19 }
0x264c   :  { %v1979_v34 = vpop.permute.xlu0 %1978 }
0x264d   :  { %v1981_v35 = vmul.f32 %v2855_v29, %v1979_v34 }
0x264f   :  { %1984 = vrot.lane.b32.xlu1 %v1981_v35, %s3040_s23 }
0x26c1   :  { %v1985_v36 = vpop.permute.xlu1 %1984 }
0x26c2   :  { %2596 = vmatmul.mubr.msk.f32.vlgmr.msra.gmra.mrb[18].mxu1 %vm260_vm2, %v1985_v36 }
0x2795   :  { %v2054_v39 = vpop.f32.mrb[18].mxu1 }
0x2796   :  { %v2058_v44 = vadd.f32 %v2054_v39, %v1254_v40  ;;  %v2597_v3 = vpop.f32.mrb[19].mxu1 }
0x2798   :  { %2858 = vtanh.f32 %v2058_v44  ;;  %v2276_v46 = vmul.f32 -1.442695, %v2058_v44 }
0x279a   :  { %2860 = vpow2.f32 %v2276_v46 }
0x27a2   :  { %v2859_v45 = vpop.eup %2858 }
0x27a3   :  { %2068 = vrot.lane.b32.xlu0 %v2859_v45, %s3039_s19 }
0x27a4   :  { %v2861_v47 = vpop.eup %2860 }
0x27a5   :  { %v2062_v48 = vadd.f32 1.0, %v2861_v47 }
0x27a7   :  { %2862 = vrcp.f32 %v2062_v48 }
0x27b1   :  { %v2863_v49 = vpop.eup %2862 }
0x27b2   :  { %v2066_v52 = vmul.f32 %v2863_v49, %v1975_v5 }
0x2815   :  { %v2069_v50 = vpop.permute.xlu0 %2068 }
0x2816   :  { %v2071_v51 = vmul.f32 %v2863_v49, %v2069_v50 }
0x2818   :  { %2073 = vrot.lane.b32.xlu1 %v2071_v51, %s3040_s23 }
0x288a   :  { %v2074_v37 = vpop.permute.xlu1 %2073 }
0x288b   :  { %v2076_v10 = vadd.f32 %v2074_v37, %v2066_v52 }
0x288d   :  { %2864 = vtanh.f32 %v2076_v10 }
0x2897   :  { %v2865_v60 = vpop.eup %2864 }
0x2898   :  { %2079 = vrot.lane.b32.xlu0 %v2865_v60, %s3039_s19  ;;  %s3042_s19 = smov [#allocation13]  }
0x2899   :  { %s2194_s22 = sshll.u32 %s3042_s19, 4  ;;  %s2195_s22 = int_to_ptr.vmem [resolvable:$true] %s2194_s22 }
0x289a   :  { %s2954_s30 = scalar_lea.vmem %s2195_s22, 256  ;;  %p2959_p5 = scmp.lt.s32.totalorder %s2195_s22, %s2195_s22 }
0x289b   :  { %p2955_p4 = scmp.ne.s32.totalorder %s2195_s22, %s2954_s30  ;;  %p2960_p6 = scmp.lt.s32.totalorder %s2954_s30, %s2954_s30 }
0x289c   :  { %1105 = vrot.lane.b32.xlu0 %v3440_v38, %s3041_s8 }
0x289d   :  { %p2961_p7 = por %p2960_p6, %p2959_p5 }
0x289f   :  { %p2962_p8 = pnand %p2961_p7, %p2955_p4 }
0x290a   :  { %v2080_v43 = vpop.permute.xlu0 %2079 }
0x290b   :  { %v2082_v61 = vmul.f32 %v2863_v49, %v2080_v43 }
0x290d   :  { %2084 = vrot.lane.b32.xlu1 %v2082_v61, %s3040_s23 }
0x290e   :  { %v1106_v4 = vpop.permute.xlu0 %1105 }
0x290f   :  { %1108 = vst.msk [vmem:[#allocation15] sm:$0xff] %vm260_vm2, %v1106_v4 }
0x2911   :  { %2090 = vrot.lane.b32.xlu1 %v2076_v10, %s3041_s8 }
0x297f   :  { %v2085_v6 = vpop.permute.xlu1 %2084 }
0x2980   :  { %2088 = vst.msk [vmem:[#allocation13 + $0x8] sm:$0xff] %vm260_vm2, %v2085_v6  ;;  %2607 = vmatmul.mubr.msk.f32.vlgmr.msra.gmra.mrb[28].mxu0 %vm260_vm2, %v2085_v6 }
0x2983   :  { %v2091_v0 = vpop.permute.xlu1 %2090 }
0x2984   :  { %2094 = vst.msk [vmem:[#allocation15 + $0x8] sm:$0xff] %vm260_vm2, %v2091_v0 }
0x2985   :  { %2965 = shalt.err (!%p2962_p8)
}
0x2986   :  { %s2966_s1 = scalar_lea.hbm %s3592_s12, 256 }
0x2987   :  { %p2967_p9 = scmp.ne.s32.totalorder %s3592_s12, %s2966_s1  ;;  %p2970_p10 = scmp.lt.u32.totalorder %s2966_s1, %s3592_s12 }
0x2989   :  { %p2972_p11 = pnand %p2970_p10, %p2967_p9 }
0x298b   :  { %2975 = shalt.err (!%p2972_p11)
}
0x298c   :  { %2200 = dma.vmem_to_hbm [thread:$0]  %s2195_s22, 256, %s3592_s12, [#allocation14], %s3032_s20, %s3032_s20, %s3033_s21  }
0x298d   :  { %s3043_s4 = smov [#allocation15]  }
0x298e   :  { %s2206_s17 = sshll.u32 %s3043_s4, 4  ;;  %s2207_s17 = int_to_ptr.vmem [resolvable:$true] %s2206_s17 }
0x298f   :  { %s2976_s6 = scalar_lea.vmem %s2207_s17, 256  ;;  %p2981_p13 = scmp.lt.s32.totalorder %s2207_s17, %s2207_s17 }
0x2990   :  { %p2977_p12 = scmp.ne.s32.totalorder %s2207_s17, %s2976_s6  ;;  %p2982_p0 = scmp.lt.s32.totalorder %s2976_s6, %s2976_s6 }
0x2992   :  { %p2983_p1 = por %p2982_p0, %p2981_p13 }
0x2994   :  { %p2984_p2 = pnand %p2983_p1, %p2977_p12 }
0x2996   :  { %2987 = shalt.err (!%p2984_p2)
}
0x2997   :  { %s2988_s25 = scalar_lea.hbm %s3593_s13, 256 }
0x2998   :  { %p2989_p3 = scmp.ne.s32.totalorder %s3593_s13, %s2988_s25  ;;  %p2992_p4 = scmp.lt.u32.totalorder %s2988_s25, %s3593_s13 }
0x299a   :  { %p2994_p5 = pnand %p2992_p4, %p2989_p3 }
0x299c   :  { %2997 = shalt.err (!%p2994_p5)
}
0x299d   :  { %2212 = dma.vmem_to_hbm [thread:$0]  %s2207_s17, 256, %s3593_s13, [#allocation14], %s3032_s20, %s3032_s20, %s3033_s21  }
0x299e   :  { %v2277_v38 = vld [vmem:[%s3590_s10] ss:$0 sm:$0xff]  ;;  %s3044_s19 = smov [#allocation12]  }
0x299f   :  { %s2185_s22 = sshll.u32 %s3044_s19, 4  ;;  %s2186_s22 = int_to_ptr.vmem [resolvable:$true] %s2185_s22 }
0x29a0   :  { %s2998_s30 = scalar_lea.vmem %s2186_s22, 128  ;;  %p3003_p7 = scmp.lt.s32.totalorder %s2186_s22, %s2186_s22 }
0x29a1   :  { %p2999_p6 = scmp.ne.s32.totalorder %s2186_s22, %s2998_s30  ;;  %p3004_p8 = scmp.lt.s32.totalorder %s2998_s30, %s2998_s30 }
0x29a3   :  { %p3005_p9 = por %p3004_p8, %p3003_p7 }
0x29a5   :  { %p3006_p10 = pnand %p3005_p9, %p2999_p6 }
0x2a53   :  { %v2174_v7 = vpop.f32.mrb[28].mxu0 }
0x2a54   :  { %v2175_v8 = vadd.f32 %v2277_v38, %v2174_v7  ;;  %v2608_v9 = vpop.f32.mrb[29].mxu0 }
0x2a56   :  { %2178 = vst [vmem:[#allocation12] sm:$0xff] %v2175_v8 }
0x2a57   :  { %3009 = shalt.err (!%p3006_p10)
}
0x2a58   :  { %s3010_s20 = scalar_lea.hbm %s3591_s11, 128 }
0x2a59   :  { %p3011_p11 = scmp.ne.s32.totalorder %s3591_s11, %s3010_s20  ;;  %p3014_p12 = scmp.lt.u32.totalorder %s3010_s20, %s3591_s11 }
0x2a5b   :  { %p3016_p13 = pnand %p3014_p12, %p3011_p11 }
0x2a5d   :  { %3019 = shalt.err (!%p3016_p13)
}
0x2a5e   :  { %2188 = dma.vmem_to_hbm [thread:$0]  %s2186_s22, 128, %s3591_s11, [#allocation6]  }
0x2a5f   :  { %3026 = dma.done.wait [#allocation6], 128  }
0x2a60   :  { %3027 = vsyncadd [#allocation6], 4294967168 }
0x2a61   :  { %3028 = dma.done.wait [#allocation14], 512  }
0x2a62   :  { %3029 = vsyncadd [#allocation14], 4294966784 }
0x2a63   :  { %2222 = vsyncpa [#allocation5], 1 }
0x2a64   :  { %2223 = vsyncpa [#allocation8], 1 }
0x2a65   :  { %2224 = vsyncpa [#allocation11], 1 }
0x2a66   :  { %2225 = vsyncpa [#allocation6], 1 }
0x2a67   :  { %2226 = vsyncpa [#allocation14], 1 }

</bundles_post_ra>
